<compile_context>
chip_gen: v7x
topology: tpu7x:2x2x1
jax: 0.10.0
libtpu: 0.0.40
codegen_flags: <defaults>
</compile_context>

<pallas_src>
import jax
import jax.numpy as jnp
from jax import lax
from jax.experimental import pallas as pl
from jax.experimental.pallas import tpu as pltpu

_LN_EPS = 1e-5  # torch.nn.LayerNorm default eps


def _layernorm_fused(h):
    """LayerNorm(elementwise_affine=False) over the last axis, one-pass stats."""
    n = h.shape[-1]
    s1 = jnp.sum(h, axis=-1, keepdims=True)
    s2 = jnp.sum(h * h, axis=-1, keepdims=True)
    mu = s1 * (1.0 / n)
    var = s2 * (1.0 / n) - mu * mu
    return (h - mu) * lax.rsqrt(var + _LN_EPS)


def spatial_map_kernel(sz_ref, xzh_ref, w1s_ref, w2_ref, b2_ref, w3v_ref,
                       gsum_ref, b3_ref, out_ref):
    tS = sz_ref.shape[0]
    X, H = xzh_ref.shape

    # --- Layer 1 (Decoder.z2h on concat([sz, xz])), split as
    #     sz @ W1s^T  (per-tile)  +  (xz @ W1x^T + b1)  (hoisted to wrapper).
    a = jnp.dot(sz_ref[...], w1s_ref[...],
                preferred_element_type=jnp.float32)                    # (tS, H)
    h = (a[:, None, :] + xzh_ref[...][None, :, :]).reshape(tS * X, H)  # (tS*X, H)
    h = jax.nn.relu(_layernorm_fused(h))

    # --- Layer 2 (Decoder.seq_nn, one LinearReLU): single dense 2-D matmul.
    h = jnp.dot(h, w2_ref[...],
                preferred_element_type=jnp.float32) + b2_ref[...]      # (tS*X, H)
    h = jax.nn.relu(_layernorm_fused(h))

    # --- h2ld restricted to output channel 0, oriented as a row vector so the
    # result is already lane-dense flat over (s, x):  (1, H) . (tS*X, H)^T.
    ld = lax.dot_general(w3v_ref[...], h, (((1,), (1,)), ((), ())),
                         preferred_element_type=jnp.float32)           # (1, tS*X)
    p = jax.nn.softplus(ld + b3_ref[0])                                # (1, tS*X)

    # --- Row-normalization over the X axis: group sum via a block-diagonal
    # ones matrix (keeps the flat lane layout), then reciprocal * p.
    denom = jnp.dot(p, gsum_ref[...],
                    preferred_element_type=jnp.float32)                # (1, tS*X)
    out_ref[...] = p * pl.reciprocal(denom, approx=False)


def _pick_tile_s(S, X, H):
    """Largest tile_s dividing S with a lane-dense (multiple-of-128) flat output
    block, fitting a conservative VMEM budget, preferring >= 2 grid steps."""
    budget = 8 * 1024 * 1024  # per-step f32 working set target (v7x-safe)
    cands = []
    for t in range(1, S + 1):
        if S % t:
            continue
        if (t * X) % 128 and (t * X) != S * X:
            continue
        work = 3 * t * X * H * 4 + (t * X) * (t * X) * 4
        if work > budget:
            continue
        cands.append(t)
    if not cands:
        return S  # fallback: single full block
    multi = [t for t in cands if S // t >= 2]
    return max(multi) if multi else max(cands)


def spatial_map(sz, xz, params, *, tile_s=None):
    """Pallas SpatialMap forward.  sz: (S, SZD), xz: (X, XZD) -> (S, X)."""
    S, SZD = sz.shape
    X, XZD = xz.shape
    H = params["w1"].shape[0]
    if tile_s is None:
        tile_s = _pick_tile_s(S, X, H)
    assert S % tile_s == 0, "S must be divisible by the row tile"
    TSX = tile_s * X

    f32 = jnp.float32
    w1 = jnp.asarray(params["w1"], f32)                       # (H, SZD+XZD)
    w1s = w1[:, :SZD].T                                       # (SZD, H)
    # Grid-invariant xz branch of the concat-linear, b1 folded in (hoisted).
    xzh = jnp.asarray(xz, f32) @ w1[:, SZD:].T + jnp.asarray(params["b1"], f32)
    w2 = jnp.asarray(params["w2"], f32).T                     # (H, H)
    b2 = jnp.asarray(params["b2"], f32)[None, :]              # (1, H)
    w3v = jnp.asarray(params["w3"], f32)[0:1, :]              # (1, H) channel 0
    b3 = jnp.asarray(params["b3"], f32)[0:1]                  # (1,)  channel 0 -> SMEM
    # Block-diagonal ones matrix: group-sum over X in the flat (s*X + x) layout.
    gsum = jnp.kron(jnp.eye(tile_s, dtype=f32), jnp.ones((X, X), f32))  # (TSX, TSX)

    grid = (S // tile_s,)
    fixed = lambda i: (0, 0)
    out_flat = pl.pallas_call(
        spatial_map_kernel,
        out_shape=jax.ShapeDtypeStruct((1, S * X), f32),
        grid=grid,
        in_specs=[
            pl.BlockSpec((tile_s, SZD), lambda i: (i, 0)),            # sz rows
            pl.BlockSpec((X, H), fixed),                              # xz@W1x + b1
            pl.BlockSpec((SZD, H), fixed),                            # W1 (sz half)
            pl.BlockSpec((H, H), fixed),                              # W2
            pl.BlockSpec((1, H), fixed),                              # b2
            pl.BlockSpec((1, H), fixed),                              # W3[0, :]
            pl.BlockSpec((TSX, TSX), fixed),                          # group-sum ones
            pl.BlockSpec(memory_space=pltpu.MemorySpace.SMEM),        # b3 scalar
        ],
        out_specs=pl.BlockSpec((1, TSX), lambda i: (0, i)),           # lane-dense flat
        compiler_params=pltpu.CompilerParams(
            dimension_semantics=("parallel",),
            vmem_limit_bytes=32 * 1024 * 1024),
    )(sz.astype(f32), xzh, w1s, w2, b2, w3v, gsum, b3)
    return out_flat.reshape(S, X)


def _layernorm_ref(h):
    mu = jnp.mean(h, axis=-1, keepdims=True)
    var = jnp.mean(jnp.square(h - mu), axis=-1, keepdims=True)
    return (h - mu) * lax.rsqrt(var + _LN_EPS)


def spatial_map_reference(sz, xz, params):
    """Pure-JAX reference mirroring the PyTorch module exactly."""
    S, SZD = sz.shape
    X, XZD = xz.shape
    cz = jnp.concatenate(
        [jnp.broadcast_to(sz[:, None, :], (S, X, SZD)),
         jnp.broadcast_to(xz[None, :, :], (S, X, XZD))], axis=-1)
    h = cz @ params["w1"].T + params["b1"]
    h = jax.nn.relu(_layernorm_ref(h))
    h = h @ params["w2"].T + params["b2"]
    h = jax.nn.relu(_layernorm_ref(h))
    ld = h @ params["w3"].T + params["b3"]
    p = jax.nn.softplus(ld[..., 0])
    return p / jnp.sum(p, axis=1, keepdims=True)


if __name__ == "__main__":
    # Small shapes consistent with SpatialMap(sz_dim=4, xz_dim=4, h_dim=32)
    S, X, SZ_DIM, XZ_DIM, H = 16, 16, 4, 4, 32
    key = jax.random.PRNGKey(0)
    k_sz, k_xz, k0, k1, k2, k3, k4, k5 = jax.random.split(key, 8)

    sz = jax.random.normal(k_sz, (S, SZ_DIM), jnp.float32)
    xz = jax.random.normal(k_xz, (X, XZ_DIM), jnp.float32)

    # Deterministic synthetic parameters (PyTorch Linear weight shapes: (out, in)).
    params = {
        "w1": jax.random.normal(k0, (H, SZ_DIM + XZ_DIM), jnp.float32) * 0.3,
        "b1": jax.random.normal(k1, (H,), jnp.float32) * 0.1,
        "w2": jax.random.normal(k2, (H, H), jnp.float32) * 0.2,
        "b2": jax.random.normal(k3, (H,), jnp.float32) * 0.1,
        "w3": jax.random.normal(k4, (2, H), jnp.float32) * 0.2,
        "b3": jax.random.normal(k5, (2,), jnp.float32) * 0.1,
    }

    attn = jax.block_until_ready(spatial_map(sz, xz, params))
    ref = jax.block_until_ready(spatial_map_reference(sz, xz, params))

    assert attn.shape == (S, X)
    assert bool(jnp.all(jnp.isfinite(attn)))
    assert bool(jnp.allclose(jnp.sum(attn, axis=1), 1.0, atol=2e-5))
    assert bool(jnp.allclose(attn, ref, rtol=2e-4, atol=2e-5))
    print("KERNEL_OK")
</pallas_src>

<mosaic_0001>
module attributes {stable_mosaic.version = 11 : i64} {
  func.func @spatial_map_kernel(%arg0: i32, %arg1: memref<8x4xf32, #tpu.memory_space<vmem>>, %arg2: memref<16x32xf32, #tpu.memory_space<vmem>>, %arg3: memref<4x32xf32, #tpu.memory_space<vmem>>, %arg4: memref<32x32xf32, #tpu.memory_space<vmem>>, %arg5: memref<1x32xf32, #tpu.memory_space<vmem>>, %arg6: memref<1x32xf32, #tpu.memory_space<vmem>>, %arg7: memref<128x128xf32, #tpu.memory_space<vmem>>, %arg8: memref<1xf32, #tpu.memory_space<smem>>, %arg9: memref<1x128xf32, #tpu.memory_space<vmem>>) attributes {dimension_semantics = [#tpu.dimension_semantics<parallel>], iteration_bounds = array<i64: 2>, scalar_prefetch = 0 : i64, scratch_operands = 0 : i64, tpu.core_type = #tpu.core_type<tc>, window_params = [{transform_indices = @transform_0, window_bounds = array<i64: 8, 4>}, {pipeline_mode = #tpu.pipeline_mode<synchronous>, transform_indices = @transform_1, window_bounds = array<i64: 16, 32>}, {pipeline_mode = #tpu.pipeline_mode<synchronous>, transform_indices = @transform_2, window_bounds = array<i64: 4, 32>}, {pipeline_mode = #tpu.pipeline_mode<synchronous>, transform_indices = @transform_3, window_bounds = array<i64: 32, 32>}, {pipeline_mode = #tpu.pipeline_mode<synchronous>, transform_indices = @transform_4, window_bounds = array<i64: 1, 32>}, {pipeline_mode = #tpu.pipeline_mode<synchronous>, transform_indices = @transform_5, window_bounds = array<i64: 1, 32>}, {pipeline_mode = #tpu.pipeline_mode<synchronous>, transform_indices = @transform_6, window_bounds = array<i64: 128, 128>}, {transform_indices = @transform_7, window_bounds = array<i64: 1>}, {transform_indices = @transform_8, window_bounds = array<i64: 1, 128>}]} {
    %c0 = arith.constant 0 : index
    %c0_0 = arith.constant 0 : index
    %0 = vector.load %arg1[%c0, %c0_0] : memref<8x4xf32, #tpu.memory_space<vmem>>, vector<8x4xf32>
    %c0_1 = arith.constant 0 : index
    %c0_2 = arith.constant 0 : index
    %1 = vector.load %arg3[%c0_1, %c0_2] : memref<4x32xf32, #tpu.memory_space<vmem>>, vector<4x32xf32>
    %cst = arith.constant dense<0.000000e+00> : vector<8x32xf32>
    %2 = tpu.matmul %0, %1, %cst {dimension_numbers = #tpu.dot_dimension_numbers<[1], [0], [0], [1], [0, 0, 1, 1], [], []>} : vector<8x4xf32>, vector<4x32xf32>, vector<8x32xf32> -> vector<8x32xf32>
    %3 = vector.shape_cast %2 : vector<8x32xf32> to vector<8x1x32xf32>
    %c0_3 = arith.constant 0 : index
    %c0_4 = arith.constant 0 : index
    %4 = vector.load %arg2[%c0_3, %c0_4] : memref<16x32xf32, #tpu.memory_space<vmem>>, vector<16x32xf32>
    %5 = vector.shape_cast %4 : vector<16x32xf32> to vector<1x16x32xf32>
    %6 = vector.broadcast %3 : vector<8x1x32xf32> to vector<8x16x32xf32>
    %7 = vector.broadcast %5 : vector<1x16x32xf32> to vector<8x16x32xf32>
    %8 = arith.addf %6, %7 : vector<8x16x32xf32>
    %9 = vector.shape_cast %8 : vector<8x16x32xf32> to vector<128x32xf32>
    %cst_5 = arith.constant dense<0.000000e+00> : vector<128xf32>
    %10 = vector.multi_reduction <add>, %9, %cst_5 [1] : vector<128x32xf32> to vector<128xf32>
    %11 = vector.shape_cast %10 : vector<128xf32> to vector<128x1xf32>
    %12 = arith.mulf %9, %9 : vector<128x32xf32>
    %cst_6 = arith.constant dense<0.000000e+00> : vector<128xf32>
    %13 = vector.multi_reduction <add>, %12, %cst_6 [1] : vector<128x32xf32> to vector<128xf32>
    %14 = vector.shape_cast %13 : vector<128xf32> to vector<128x1xf32>
    %cst_7 = arith.constant 3.125000e-02 : f32
    %15 = vector.broadcast %cst_7 : f32 to vector<128x1xf32>
    %16 = arith.mulf %11, %15 : vector<128x1xf32>
    %cst_8 = arith.constant 3.125000e-02 : f32
    %17 = vector.broadcast %cst_8 : f32 to vector<128x1xf32>
    %18 = arith.mulf %14, %17 : vector<128x1xf32>
    %19 = arith.mulf %16, %16 : vector<128x1xf32>
    %20 = arith.subf %18, %19 : vector<128x1xf32>
    %21 = vector.broadcast %16 : vector<128x1xf32> to vector<128x32xf32>
    %22 = arith.subf %9, %21 : vector<128x32xf32>
    %cst_9 = arith.constant 9.99999974E-6 : f32
    %23 = vector.broadcast %cst_9 : f32 to vector<128x1xf32>
    %24 = arith.addf %20, %23 : vector<128x1xf32>
    %25 = math.rsqrt %24 : vector<128x1xf32>
    %26 = vector.broadcast %25 : vector<128x1xf32> to vector<128x32xf32>
    %27 = arith.mulf %22, %26 : vector<128x32xf32>
    %cst_10 = arith.constant 0.000000e+00 : f32
    %28 = vector.broadcast %cst_10 : f32 to vector<128x32xf32>
    %29 = arith.maximumf %27, %28 : vector<128x32xf32>
    %c0_11 = arith.constant 0 : index
    %c0_12 = arith.constant 0 : index
    %30 = vector.load %arg4[%c0_11, %c0_12] : memref<32x32xf32, #tpu.memory_space<vmem>>, vector<32x32xf32>
    %cst_13 = arith.constant dense<0.000000e+00> : vector<128x32xf32>
    %31 = tpu.matmul %29, %30, %cst_13 {dimension_numbers = #tpu.dot_dimension_numbers<[1], [0], [0], [1], [0, 0, 1, 1], [], []>} : vector<128x32xf32>, vector<32x32xf32>, vector<128x32xf32> -> vector<128x32xf32>
    %c0_14 = arith.constant 0 : index
    %c0_15 = arith.constant 0 : index
    %32 = vector.load %arg5[%c0_14, %c0_15] : memref<1x32xf32, #tpu.memory_space<vmem>>, vector<1x32xf32>
    %33 = vector.broadcast %32 : vector<1x32xf32> to vector<128x32xf32>
    %34 = arith.addf %31, %33 : vector<128x32xf32>
    %cst_16 = arith.constant dense<0.000000e+00> : vector<128xf32>
    %35 = vector.multi_reduction <add>, %34, %cst_16 [1] : vector<128x32xf32> to vector<128xf32>
    %36 = vector.shape_cast %35 : vector<128xf32> to vector<128x1xf32>
    %37 = arith.mulf %34, %34 : vector<128x32xf32>
    %cst_17 = arith.constant dense<0.000000e+00> : vector<128xf32>
    %38 = vector.multi_reduction <add>, %37, %cst_17 [1] : vector<128x32xf32> to vector<128xf32>
    %39 = vector.shape_cast %38 : vector<128xf32> to vector<128x1xf32>
    %cst_18 = arith.constant 3.125000e-02 : f32
    %40 = vector.broadcast %cst_18 : f32 to vector<128x1xf32>
    %41 = arith.mulf %36, %40 : vector<128x1xf32>
    %cst_19 = arith.constant 3.125000e-02 : f32
    %42 = vector.broadcast %cst_19 : f32 to vector<128x1xf32>
    %43 = arith.mulf %39, %42 : vector<128x1xf32>
    %44 = arith.mulf %41, %41 : vector<128x1xf32>
    %45 = arith.subf %43, %44 : vector<128x1xf32>
    %46 = vector.broadcast %41 : vector<128x1xf32> to vector<128x32xf32>
    %47 = arith.subf %34, %46 : vector<128x32xf32>
    %cst_20 = arith.constant 9.99999974E-6 : f32
    %48 = vector.broadcast %cst_20 : f32 to vector<128x1xf32>
    %49 = arith.addf %45, %48 : vector<128x1xf32>
    %50 = math.rsqrt %49 : vector<128x1xf32>
    %51 = vector.broadcast %50 : vector<128x1xf32> to vector<128x32xf32>
    %52 = arith.mulf %47, %51 : vector<128x32xf32>
    %cst_21 = arith.constant 0.000000e+00 : f32
    %53 = vector.broadcast %cst_21 : f32 to vector<128x32xf32>
    %54 = arith.maximumf %52, %53 : vector<128x32xf32>
    %c0_22 = arith.constant 0 : index
    %c0_23 = arith.constant 0 : index
    %55 = vector.load %arg6[%c0_22, %c0_23] : memref<1x32xf32, #tpu.memory_space<vmem>>, vector<1x32xf32>
    %cst_24 = arith.constant dense<0.000000e+00> : vector<1x128xf32>
    %56 = tpu.matmul %55, %54, %cst_24 {dimension_numbers = #tpu.dot_dimension_numbers<[1], [1], [0], [0], [0, 0, 1, 0], [], []>} : vector<1x32xf32>, vector<128x32xf32>, vector<1x128xf32> -> vector<1x128xf32>
    %c0_25 = arith.constant 0 : index
    %57 = memref.load %arg8[%c0_25] : memref<1xf32, #tpu.memory_space<smem>>
    %58 = vector.broadcast %57 : f32 to vector<1x128xf32>
    %59 = arith.addf %56, %58 : vector<1x128xf32>
    %cst_26 = arith.constant 0.000000e+00 : f32
    %60 = vector.broadcast %cst_26 : f32 to vector<1x128xf32>
    %61 = arith.maximumf %59, %60 : vector<1x128xf32>
    %62 = vector.broadcast %cst_26 : f32 to vector<1x128xf32>
    %63 = arith.subf %59, %62 : vector<1x128xf32>
    %64 = arith.cmpf one, %63, %63 : vector<1x128xf32>
    %65 = vector.broadcast %cst_26 : f32 to vector<1x128xf32>
    %66 = arith.addf %59, %65 : vector<1x128xf32>
    %67 = math.absf %63 : vector<1x128xf32>
    %cst_27 = arith.constant 0.000000e+00 : f32
    %68 = vector.broadcast %cst_27 : f32 to vector<1x128xf32>
    %69 = arith.subf %68, %67 : vector<1x128xf32>
    %70 = math.exp %69 : vector<1x128xf32>
    %71 = math.log1p %70 : vector<1x128xf32>
    %72 = arith.addf %61, %71 : vector<1x128xf32>
    %73 = arith.select %64, %66, %72 : vector<1x128xi1>, vector<1x128xf32>
    %c0_28 = arith.constant 0 : index
    %c0_29 = arith.constant 0 : index
    %74 = vector.load %arg7[%c0_28, %c0_29] : memref<128x128xf32, #tpu.memory_space<vmem>>, vector<128x128xf32>
    %cst_30 = arith.constant dense<0.000000e+00> : vector<1x128xf32>
    %75 = tpu.matmul %73, %74, %cst_30 {dimension_numbers = #tpu.dot_dimension_numbers<[1], [0], [0], [1], [0, 0, 1, 1], [], []>} : vector<1x128xf32>, vector<128x128xf32>, vector<1x128xf32> -> vector<1x128xf32>
    %76 = tpu.reciprocal %75 : vector<1x128xf32> -> vector<1x128xf32>
    %77 = arith.mulf %73, %76 : vector<1x128xf32>
    %c0_31 = arith.constant 0 : index
    %c0_32 = arith.constant 0 : index
    %78 = vector.load %arg9[%c0_31, %c0_32] : memref<1x128xf32, #tpu.memory_space<vmem>>, vector<1x128xf32>
    tpu.vector_store %arg9[%c0_31, %c0_32], %77 {strides = array<i32>} : memref<1x128xf32, #tpu.memory_space<vmem>>, vector<1x128xf32>,
    return
  }
  func.func @transform_0(%arg0: i32) -> (i32, i32) {
    %c0_i32 = arith.constant 0 : i32
    %c0_i32_0 = arith.constant 0 : i32
    return %arg0, %c0_i32 : i32, i32
  }
  func.func @transform_1(%arg0: i32) -> (i32, i32) {
    %c0_i32 = arith.constant 0 : i32
    %c0_i32_0 = arith.constant 0 : i32
    %c0_i32_1 = arith.constant 0 : i32
    return %c0_i32, %c0_i32_0 : i32, i32
  }
  func.func @transform_2(%arg0: i32) -> (i32, i32) {
    %c0_i32 = arith.constant 0 : i32
    %c0_i32_0 = arith.constant 0 : i32
    %c0_i32_1 = arith.constant 0 : i32
    return %c0_i32, %c0_i32_0 : i32, i32
  }
  func.func @transform_3(%arg0: i32) -> (i32, i32) {
    %c0_i32 = arith.constant 0 : i32
    %c0_i32_0 = arith.constant 0 : i32
    %c0_i32_1 = arith.constant 0 : i32
    return %c0_i32, %c0_i32_0 : i32, i32
  }
  func.func @transform_4(%arg0: i32) -> (i32, i32) {
    %c0_i32 = arith.constant 0 : i32
    %c0_i32_0 = arith.constant 0 : i32
    %c0_i32_1 = arith.constant 0 : i32
    return %c0_i32, %c0_i32_0 : i32, i32
  }
  func.func @transform_5(%arg0: i32) -> (i32, i32) {
    %c0_i32 = arith.constant 0 : i32
    %c0_i32_0 = arith.constant 0 : i32
    %c0_i32_1 = arith.constant 0 : i32
    return %c0_i32, %c0_i32_0 : i32, i32
  }
  func.func @transform_6(%arg0: i32) -> (i32, i32) {
    %c0_i32 = arith.constant 0 : i32
    %c0_i32_0 = arith.constant 0 : i32
    %c0_i32_1 = arith.constant 0 : i32
    return %c0_i32, %c0_i32_0 : i32, i32
  }
  func.func @transform_7(%arg0: i32) -> i32 {
    %c0_i32 = arith.constant 0 : i32
    %c0_i32_0 = arith.constant 0 : i32
    return %c0_i32 : i32
  }
  func.func @transform_8(%arg0: i32) -> (i32, i32) {
    %c0_i32 = arith.constant 0 : i32
    %c0_i32_0 = arith.constant 0 : i32
    return %c0_i32, %arg0 : i32, i32
  }
}

</mosaic_0001>

<bundles_post_ra>
// kernel: tpu_custom_call.1
= control target key start
LH: loop header
LB: loop body
LE: loop exit
PB: predicated region body
PF: predicated region fallthrough
CT: control target
= control target key end

     0   :  { %s2885_s0 = inlined_call_operand.vmem [shape: f32[16,4], index: 0, kind: input, shape index: {}]   ;;  %s2886_s1 = inlined_call_operand.hbm [shape: f32[16,32], index: 1, kind: input, shape index: {}]   ;;  %s2887_s2 = inlined_call_operand.hbm [shape: f32[4,32], index: 2, kind: input, shape index: {}]   ;;  %s2888_s3 = inlined_call_operand.vmem [shape: f32[32,32], index: 3, kind: input, shape index: {}]   ;;  %s2889_s4 = inlined_call_operand.vmem [shape: f32[1,32], index: 4, kind: input, shape index: {}]   ;;  %s2890_s5 = inlined_call_operand.vmem [shape: f32[1,32], index: 5, kind: input, shape index: {}]   ;;  %s2891_s6 = inlined_call_operand.hbm [shape: f32[128,128], index: 6, kind: input, shape index: {}]   ;;  %s2892_s7 = inlined_call_operand.<no memory space> [shape: f32[1], index: 7, kind: input, shape index: {}]   ;;  %s2893_s8 = inlined_call_operand.hbm [shape: f32[1,256], index: 8, kind: output, shape index: {}]  }
   0x1   :  { %2897 = sst [smem:[#allocation14_spill]] %s2887_s2 }
   0x2   :  { %13 = sst [smem:[#allocation2]] %s2892_s7 }
   0x3   :  { %14 = vsyncpa [#allocation4], 0 }
   0x4   :  { %15 = vsyncpa [#allocation7], 0 }
   0x5   :  { %16 = vsyncpa [#allocation5], 0 }
   0x6   :  { %18 = vsyncpa [#allocation5 + $0x1], 0  ;;  %s2215_s29 = smov 0   ;;  %s2217_s30 = smov 0  }
   0x7   :  { %s2219_s9 = smov 0   ;;  %s2221_s10 = smov 0  }
   0x8 LB: > { %s2236_s7 = sadd.s32 4294967295, %s2155_s10   ;;  %s1578_s11 = sadd.s32 4294967294, %s2155_s10   ;;  %s2155_s10 = sphi %s2221_s10, %s2918_s10   ;;  %s2151_s9 = sphi %s2219_s9, %s2917_s9   ;;  %s2147_s30 = sphi %s2217_s30, %s2916_s30   ;;  %s2143_s29 = sphi %s2215_s29, %s2915_s29  }
   0x9   : > { %s2240_s12 = sadd.s32 1, %s2155_s10   ;;  %s204_s13 = sadd.s32 1, %s2151_s9 }
   0xa   : > { %s201_s14 = ssub.s32 %s2155_s10, %s2240_s12  ;;  %p214_p0 = scmp.ne.s32.totalorder %s2151_s9, %s2147_s30 }
   0xb   : > { %p202_p1 = scmp.eq.s32.totalorder %s201_s14, 0  ;;  %p215_p2 = scmp.eq.s32.totalorder %s2236_s7, 1 }
   0xc   : > { %p220_p3 = scmp.ne.s32.totalorder %s2147_s30, %s2143_s29  ;;  %p221_p4 = scmp.eq.s32.totalorder %s1578_s11, 1 }
   0xd   : > { %s2251_s15 = scalar_select %p202_p1, %s2151_s9, %s204_s13  }
   0xe   : > { %p2253_p5 = por %p215_p2, %p214_p0  ;;  %p2257_p6 = por %p221_p4, %p220_p3 }
   0xf   : > { %2898 = sst [smem:[#allocation13_spill]] %s2251_s15  ;;  %p1579_p7 = scmp.ge.s32.totalorder %s2155_s10, 1 }
  0x10   : > { %s2899_s16 = scalar_select %p2253_p5, 1, 0 }
  0x11   : > { %s2900_s17 = scalar_select %p2257_p6, 1, 0 }
  0x12   : > { %p228_p8 = scmp.lt.s32.totalorder %s2155_s10, 3  ;;  %p2894_p9 = scmp.eq.s32.totalorder %s2236_s7, 0 }
  0x13   : > { %s2157_s19 = smov [#allocation6]   ;;  %s2158_s21 = smov [#allocation3]  }
  0x14   : > { %p2264_p10 = pnand %p1579_p7, %p228_p8  ;;  %s254_s20 = sshll.u32 %s2157_s19, 4  ;;  %s255_s20 = int_to_ptr.vmem [resolvable:$true] %s254_s20 }
  0x15   : > { %s240_s22 = sshll.u32 %s2158_s21, 4  ;;  %s2159_s24 = smov [#allocation8]   ;;  %s2276_s22 = int_to_ptr.vmem [resolvable:$true] %s240_s22 }
  0x16   : > { %s2901_s18 = scalar_select %p2264_p10, 1, 0 }
  0x17   : > { %p1869_p11 = pneg %p2264_p10  ;;  %s2278_s25 = sshll.u32 %s2159_s24, 4  ;;  %s274_s25 = int_to_ptr.vmem [resolvable:$true] %s2278_s25 }
  0x18   : > { %s2903_s2 = sld [smem:[#allocation14_spill]] }
  0x19   : > { %p2272_p12 = pnand %p2894_p9, %p1869_p11 }
  0x1b   : > { %p2288_p0 = pneg %p2272_p12 }
  0x1e   : > { %s2001_s28 = scalar_lea.hbm %s2903_s2, 64 }
  0x1f   : > { %p2002_p13 = scmp.ne.s32.totalorder %s2903_s2, %s2001_s28  ;;  %p2008_p3 = scmp.lt.u32.totalorder %s2001_s28, %s2903_s2 }
  0x21   : > { %p2004_p1 = pnand %p2288_p0, %p2002_p13 }
  0x23   : > { %p2005_p2 = pneg %p2004_p1 }
  0x25   : > { %p2010_p4 = pnand %p2008_p3, %p2005_p2 }
  0x27   : > { %2013 = shalt.err (!%p2010_p4)
}
  0x28   : > { %s2014_s24 = scalar_lea.vmem %s255_s20, 64  ;;  %p2022_p9 = scmp.lt.s32.totalorder %s255_s20, %s255_s20 }
  0x29   : > { %p2015_p7 = scmp.ne.s32.totalorder %s255_s20, %s2014_s24  ;;  %p2023_p6 = scmp.lt.s32.totalorder %s2014_s24, %s2014_s24 }
  0x2b   : > { %p2017_p8 = pnand %p2015_p7, %p2288_p0  ;;  %p2024_p5 = por %p2023_p6, %p2022_p9 }
  0x2d   : > { %p2018_p11 = pneg %p2017_p8 }
  0x2f   : > { %p2025_p10 = pnand %p2024_p5, %p2018_p11 }
  0x31   : > { %2028 = shalt.err (!%p2025_p10)
}
  0x32   : > { %1875 = dma.hbm_to_vmem [thread:$0]  (!%p2272_p12), %s2903_s2, 64, %s255_s20, [#allocation7]  }
  0x33   : > { %s2029_s13 = scalar_lea.hbm %s2886_s1, 256 }
  0x34   : > { %p2030_p13 = scmp.ne.s32.totalorder %s2886_s1, %s2029_s13  ;;  %p2036_p5 = scmp.lt.u32.totalorder %s2029_s13, %s2886_s1 }
  0x36   : > { %p2032_p1 = pnand %p2030_p13, %p2288_p0 }
  0x38   : > { %p2033_p6 = pneg %p2032_p1 }
  0x3a   : > { %p2038_p9 = pnand %p2036_p5, %p2033_p6 }
  0x3c   : > { %2041 = shalt.err (!%p2038_p9)
}
  0x3d   : > { %s2042_s20 = scalar_lea.vmem %s2276_s22, 256  ;;  %p2050_p4 = scmp.lt.s32.totalorder %s2276_s22, %s2276_s22 }
  0x3e   : > { %p2043_p10 = scmp.ne.s32.totalorder %s2276_s22, %s2042_s20  ;;  %p2051_p7 = scmp.lt.s32.totalorder %s2042_s20, %s2042_s20 }
  0x40   : > { %p2045_p2 = pnand %p2043_p10, %p2288_p0  ;;  %p2052_p8 = por %p2051_p7, %p2050_p4 }
  0x42   : > { %p2046_p3 = pneg %p2045_p2 }
  0x44   : > { %p2053_p11 = pnand %p2052_p8, %p2046_p3 }
  0x46   : > { %2056 = shalt.err (!%p2053_p11)
}
  0x47   : > { %s2160_s26 = smov 128   ;;  %s2161_s15 = smov 8  }
  0x48   : > { %1872 = dma.hbm_to_vmem [thread:$0]  (!%p2272_p12), %s2886_s1, 256, %s2276_s22, [#allocation4], %s2160_s26, %s2160_s26, %s2161_s15  }
  0x49   : > { %s2057_s19 = scalar_lea.hbm %s2891_s6, 2048 }
  0x4a   : > { %p2058_p13 = scmp.ne.s32.totalorder %s2891_s6, %s2057_s19  ;;  %p2064_p5 = scmp.lt.u32.totalorder %s2057_s19, %s2891_s6 }
  0x4c   : > { %p2060_p1 = pnand %p2058_p13, %p2288_p0 }
  0x4e   : > { %p2061_p6 = pneg %p2060_p1 }
  0x50   : > { %p2066_p9 = pnand %p2064_p5, %p2061_p6 }
  0x52   : > { %2069 = shalt.err (!%p2066_p9)
}
  0x53   : > { %s2070_s27 = scalar_lea.vmem %s274_s25, 2048  ;;  %p2078_p4 = scmp.lt.s32.totalorder %s274_s25, %s274_s25 }
  0x54   : > { %p2071_p10 = scmp.ne.s32.totalorder %s274_s25, %s2070_s27  ;;  %p2079_p7 = scmp.lt.s32.totalorder %s2070_s27, %s2070_s27 }
  0x56   : > { %p2073_p2 = pnand %p2071_p10, %p2288_p0  ;;  %p2080_p8 = por %p2079_p7, %p2078_p4 }
  0x58   : > { %p2074_p3 = pneg %p2073_p2 }
  0x5a   : > { %p2081_p11 = pnand %p2080_p8, %p2074_p3 }
  0x5c   : > { %2084 = shalt.err (!%p2081_p11)
}
  0x5d   : > { %1878 = dma.hbm_to_vmem [thread:$0]  (!%p2272_p12), %s2891_s6, 2048, %s274_s25, [#allocation7], %s2160_s26, %s2160_s26, %s2161_s15  }
  0x5e   : > { %p2905_p13 = scmp.ne.s32.totalorder %s2901_s18, 0 }
  0x5f   : > { %p2906_p1 = scmp.eq.s32.totalorder (!%p2905_p13), %s2236_s7, 0 }
  0x60   : > { %299 = sbr.rel (%p2905_p13) target bundleno = 1442 (0x5a2), region = 52 }
  0x67   : > { %2130 = dma.done.wait (%p2906_p1), [#allocation4], 256   ;;  %p2907_p0 = pmov %p2906_p1 }
  0x69   : > { %2132 = vsyncadd (%p2907_p0), [#allocation4], 4294967040  ;;  %p2908_p6 = pmov %p2907_p0 }
  0x6a   : > { %p2909_p5 = pmov %p2907_p0 }
  0x6b   : > { %2134 = dma.done.wait (%p2908_p6), [#allocation7], 2112  }
  0x6c   : > { %2136 = vsyncadd (%p2909_p5), [#allocation7], 4294965184  ;;  %p339_p9 = scmp.lt.s32.totalorder %s2236_s7, 1  ;;  %v2162_v0 = vmov 0.0   ;;  %vm2163_vm0 = vmmov 0   ;;  %vm349_vm1 = vcmask 1043456   ;;  %v428_v5 = vlaneseq }
  0x6d   : > { %1684 = vmatprep.subr.mxu1 %v2162_v0  ;;  %1686 = vmatprep.mubr.msk.f32.mxu1 %vm2163_vm0, %v2162_v0  ;;  %vm345_vm2 = vcmask 31744   ;;  %v344_v1 = vld [vmem:[#allocation6] sm:$0xf]  ;;  %v2164_v3 = vmov 1966171168   ;;  %v2372_v15 = vld [vmem:[#allocation3] sm:$0xff] }
  0x6e   : > { %s340_s2 = scalar_select %p339_p9, %s2236_s7, 1  ;;  %1753 = vmatprep.mubr.msk.f32.mxu0 %vm2163_vm0, %v2162_v0  ;;  %1685 = vmatpush3.msk.msra.mxu1 %vm349_vm1, %v344_v1  ;;  %v426_v4 = vunpack.c.l.s4 %v2164_v3  ;;  %v429_v7 = vshrl.u32 %v428_v5, 7  ;;  %v2374_v16 = vld [vmem:[#allocation3 + $0x8] sm:$0xff]  ;;  %vm531_vm3 = vcmask 261120  }
  0x6f   : > { %vm2753_vm4 = vmpackc.low %vm531_vm3, %vm531_vm3  ;;  %s337_s23 = sand.u32 1, %s2147_s30   ;;  %s1625_s25 = sshll.u32 %s2236_s7, 4 }
  0x70   : > { %s1588_s18 = sshll.u32 %s340_s2, 3  ;;  %v427_v6 = vunpack.c.0.s8 %v426_v4  ;;  %v2369_v12 = vsub.s32 0, %v429_v7  ;;  %s2843_s13 = scalar_lea.hbm %s2893_s8, %s1625_s25 }
  0x71   : > { %s342_s14 = scalar_lea.vmem %s2885_s0, %s1588_s18  ;;  %s1249_s18 = sld [smem:[#allocation2]] }
  0x72   : > { %v343_v2 = vld [vmem:[%s342_s14] sm:$0xff]  ;;  %v2366_v8 = vsub.s32 %v427_v6, %v429_v7  ;;  %s338_s14 = scalar_lea.vmem [#allocation9], %s337_s23  ;;  %s1480_s19 = scalar_lea.sflag [#allocation5], %s337_s23 }
  0x73   : > { %1687 = vmatmul.mubr.msk.f32.vlgmr.msra.gmra.mrb[0].mxu1 %vm345_vm2, %v343_v2  ;;  %s1492_s26 = sshll.u32 %s338_s14, 4  ;;  %p2912_p10 = scmp.ne.s32.totalorder %s2899_s16, 0  ;;  %s2845_s26 = int_to_ptr.vmem [resolvable:$true] %s1492_s26 }
  0x74   : > { %s2085_s21 = scalar_lea.vmem %s2845_s26, 16  ;;  %s2166_s7 = smov [#allocation9]  }
  0x75   : > { %p2086_p12 = scmp.ne.s32.totalorder %s2845_s26, %s2085_s21  ;;  %s2089_s24 = sshll.u32 %s2166_s7, 4  ;;  %s2090_s24 = int_to_ptr.vmem [resolvable:$false] %s2089_s24 }
  0x76   : > { %s2091_s20 = scalar_lea.vmem %s2090_s24, 32  ;;  %p2092_p4 = scmp.lt.s32.totalorder %s2845_s26, %s2090_s24 }
  0x77   : > { %p2087_p2 = pnand %p2086_p12, %p2912_p10  ;;  %p2093_p7 = scmp.lt.s32.totalorder %s2091_s20, %s2085_s21 }
  0x79   : > { %p2088_p3 = pneg %p2087_p2  ;;  %p2094_p8 = por %p2093_p7, %p2092_p4 }
  0x7b   : > { %p2095_p11 = pnand %p2094_p8, %p2088_p3 }
 0x146   : > { %v419_v9 = vpop.f32.mrb[0].mxu1 }
 0x147   : > { %v431_v10 = vrot.slane %v419_v9, %v2366_v8  ;;  %v1688_v11 = vpop.f32.mrb[1].mxu1  ;;  %v424_v36 = vcombine.high %v419_v9, %v419_v9  ;;  %v788_v9 = vld [vmem:[%s2888_s3] sm:$0xff] }
 0x149   : > { %v439_v13 = vcombine.high %v431_v10, %v431_v10  ;;  %v447_v14 = vrot.slane %v431_v10, %v2366_v8  ;;  %v438_v42 = vrot.slane %v424_v36, %v2366_v8  ;;  %v789_v10 = vld [vmem:[%s2888_s3 + $0x8] sm:$0xff] }
 0x14a   : > { %v1791_v11 = vpack.c.bf16 %v789_v10, %v788_v9 }
 0x14b   : > { %v461_v17 = vrot.slane %v439_v13, %v2366_v8  ;;  %v478_v18 = vrot.slane %v447_v14, %v2369_v12  ;;  %v469_v26 = vcombine.high %v447_v14, %v447_v14  ;;  %v454_v48 = vrot.slane %v438_v42, %v2366_v8 }
 0x14c   : > { %v440_v53 = vcombine.high %v438_v42, %v438_v42  ;;  %1792 = vmatprep.subr.bf16.mxu1 %v1791_v11 }
 0x14d   : > { %v2379_v19 = vadd.f32 %v478_v18, %v2372_v15  ;;  %v2382_v20 = vadd.f32 %v478_v18, %v2374_v16  ;;  %v482_v23 = vrot.slane %v461_v17, %v2369_v12  ;;  %v486_v33 = vrot.slane %v469_v26, %v2369_v12  ;;  %1794 = vmatpush3.bf16.msra.mxu1 %v1791_v11 }
 0x14e   : > { %v471_v37 = vcombine.high %v461_v17, %v461_v17  ;;  %v494_v56 = vrot.slane %v454_v48, %v2369_v12  ;;  %v468_v59 = vrot.slane %v440_v53, %v2366_v8  ;;  %v470_v6 = vcombine.high %v454_v48, %v454_v48 }
 0x14f   : > { %v532_v21 = vsel %vm531_vm3, %v2379_v19, 0.0  ;;  %v580_v22 = vmul.f32 %v2379_v19, %v2379_v19  ;;  %v581_v25 = vmul.f32 %v2382_v20, %v2382_v20  ;;  %v535_v27 = vsel %vm531_vm3, %v2382_v20, 0.0 }
 0x150   : > { %533 = vadd.xlane.f32.xlu0 %v532_v21  ;;  %v2395_v28 = vadd.f32 %v482_v23, %v2372_v15  ;;  %v2399_v30 = vadd.f32 %v482_v23, %v2374_v16  ;;  %v2412_v39 = vadd.f32 %v486_v33, %v2372_v15  ;;  %v2416_v41 = vadd.f32 %v486_v33, %v2374_v16 }
 0x151   : > { %v596_v24 = vsel %vm531_vm3, %v580_v22, 0.0  ;;  %v599_v29 = vsel %vm531_vm3, %v581_v25, 0.0  ;;  %v490_v45 = vrot.slane %v471_v37, %v2369_v12  ;;  %v2449_v61 = vadd.f32 %v494_v56, %v2372_v15  ;;  %v791_v25 = vld [vmem:[%s2888_s3 + $0x18] sm:$0xff] }
 0x152   : > { %597 = vadd.xlane.f32.xlu1 %v596_v24  ;;  %v538_v31 = vsel %vm531_vm3, %v2395_v28, 0.0  ;;  %v582_v32 = vmul.f32 %v2395_v28, %v2395_v28  ;;  %v541_v34 = vsel %vm531_vm3, %v2399_v30, 0.0  ;;  %v583_v35 = vmul.f32 %v2399_v30, %v2399_v30  ;;  %v790_v24 = vld [vmem:[%s2888_s3 + $0x10] sm:$0xff] }
 0x153   : > { %v544_v43 = vsel %vm531_vm3, %v2412_v39, 0.0  ;;  %v584_v44 = vmul.f32 %v2412_v39, %v2412_v39  ;;  %v547_v46 = vsel %vm531_vm3, %v2416_v41, 0.0  ;;  %v585_v47 = vmul.f32 %v2416_v41, %v2416_v41 }
 0x154   : > { %536 = vadd.xlane.f32.xlu0 %v535_v27  ;;  %v602_v38 = vsel %vm531_vm3, %v582_v32, 0.0  ;;  %v605_v40 = vsel %vm531_vm3, %v583_v35, 0.0  ;;  %v2431_v50 = vadd.f32 %v490_v45, %v2372_v15  ;;  %v2435_v52 = vadd.f32 %v490_v45, %v2374_v16 }
 0x155   : > { %v608_v49 = vsel %vm531_vm3, %v584_v44, 0.0  ;;  %v611_v51 = vsel %vm531_vm3, %v585_v47, 0.0  ;;  %v2453_v63 = vadd.f32 %v494_v56, %v2374_v16  ;;  %v556_v1 = vsel %vm531_vm3, %v2449_v61, 0.0 }
 0x156   : > { %600 = vadd.xlane.f32.xlu1 %v599_v29  ;;  %v550_v54 = vsel %vm531_vm3, %v2431_v50, 0.0  ;;  %v586_v55 = vmul.f32 %v2431_v50, %v2431_v50  ;;  %v553_v57 = vsel %vm531_vm3, %v2435_v52, 0.0  ;;  %v587_v58 = vmul.f32 %v2435_v52, %v2435_v52 }
 0x157   : > { %v588_v2 = vmul.f32 %v2449_v61, %v2449_v61  ;;  %v498_v3 = vrot.slane %v468_v59, %v2369_v12  ;;  %v559_v4 = vsel %vm531_vm3, %v2453_v63, 0.0  ;;  %v589_v5 = vmul.f32 %v2453_v63, %v2453_v63 }
 0x158   : > { %539 = vadd.xlane.f32.xlu0 %v538_v31  ;;  %v614_v60 = vsel %vm531_vm3, %v586_v55, 0.0  ;;  %v617_v62 = vsel %vm531_vm3, %v587_v58, 0.0  ;;  %v502_v21 = vrot.slane %v470_v6, %v2369_v12  ;;  %v472_v29 = vcombine.high %v468_v59, %v468_v59 }
 0x159   : > { %v620_v7 = vsel %vm531_vm3, %v588_v2, 0.0  ;;  %v2466_v8 = vadd.f32 %v498_v3, %v2372_v15  ;;  %v623_v13 = vsel %vm531_vm3, %v589_v5, 0.0  ;;  %v2476_v14 = vadd.f32 %v498_v3, %v2374_v16 }
 0x15a   : > { %542 = vadd.xlane.f32.xlu1 %v541_v34  ;;  %v2495_v27 = vadd.f32 %v502_v21, %v2372_v15  ;;  %v1795_v31 = vpack.c.bf16 %v791_v25, %v790_v24  ;;  %v2499_v33 = vadd.f32 %v502_v21, %v2374_v16  ;;  %v506_v36 = vrot.slane %v472_v29, %v2369_v12 }
 0x15b   : > { %v562_v17 = vsel %vm531_vm3, %v2466_v8, 0.0  ;;  %v590_v18 = vmul.f32 %v2466_v8, %v2466_v8  ;;  %v565_v22 = vsel %vm531_vm3, %v2476_v14, 0.0  ;;  %v591_v23 = vmul.f32 %v2476_v14, %v2476_v14 }
 0x15c   : > { %603 = vadd.xlane.f32.xlu0 %v602_v38  ;;  %1796 = vmatprep.subr.bf16.mxu1 %v1795_v31  ;;  %v568_v34 = vsel %vm531_vm3, %v2495_v27, 0.0  ;;  %v592_v35 = vmul.f32 %v2495_v27, %v2495_v27  ;;  %v571_v37 = vsel %vm531_vm3, %v2499_v33, 0.0  ;;  %v593_v38 = vmul.f32 %v2499_v33, %v2499_v33 }
 0x15d   : > { %v626_v26 = vsel %vm531_vm3, %v590_v18, 0.0  ;;  %v629_v32 = vsel %vm531_vm3, %v591_v23, 0.0  ;;  %1798 = vmatpush3.bf16.msra.mxu1 %v1795_v31  ;;  %v2512_v42 = vadd.f32 %v506_v36, %v2372_v15  ;;  %v2516_v44 = vadd.f32 %v506_v36, %v2374_v16 }
 0x15e   : > { %606 = vadd.xlane.f32.xlu1 %v605_v40  ;;  %v632_v40 = vsel %vm531_vm3, %v592_v35, 0.0 }
 0x15f   : > { %v574_v12 = vsel %vm531_vm3, %v2512_v42, 0.0  ;;  %v594_v45 = vmul.f32 %v2512_v42, %v2512_v42  ;;  %v595_v15 = vmul.f32 %v2516_v44, %v2516_v44 }
 0x160   : > { %545 = vadd.xlane.f32.xlu0 %v544_v43  ;;  %v635_v43 = vsel %vm531_vm3, %v593_v38, 0.0 }
 0x161   : > { %v638_v47 = vsel %vm531_vm3, %v594_v45, 0.0  ;;  %v641_v16 = vsel %vm531_vm3, %v595_v15, 0.0 }
 0x162   : > { %548 = vadd.xlane.f32.xlu1 %v547_v46  ;;  %v577_v46 = vsel %vm531_vm3, %v2516_v44, 0.0 }
 0x164   : > { %609 = vadd.xlane.f32.xlu0 %v608_v49 }
 0x166   : > { %612 = vadd.xlane.f32.xlu1 %v611_v51 }
 0x168   : > { %551 = vadd.xlane.f32.xlu0 %v550_v54 }
 0x16a   : > { %554 = vadd.xlane.f32.xlu1 %v553_v57 }
 0x16c   : > { %615 = vadd.xlane.f32.xlu0 %v614_v60 }
 0x16e   : > { %618 = vadd.xlane.f32.xlu1 %v617_v62 }
 0x170   : > { %557 = vadd.xlane.f32.xlu0 %v556_v1 }
 0x172   : > { %560 = vadd.xlane.f32.xlu1 %v559_v4 }
 0x174   : > { %621 = vadd.xlane.f32.xlu0 %v620_v7 }
 0x176   : > { %624 = vadd.xlane.f32.xlu1 %v623_v13 }
 0x178   : > { %563 = vadd.xlane.f32.xlu0 %v562_v17 }
 0x17a   : > { %566 = vadd.xlane.f32.xlu1 %v565_v22 }
 0x17c   : > { %627 = vadd.xlane.f32.xlu0 %v626_v26 }
 0x17e   : > { %630 = vadd.xlane.f32.xlu1 %v629_v32 }
 0x180   : > { %569 = vadd.xlane.f32.xlu0 %v568_v34 }
 0x182   : > { %572 = vadd.xlane.f32.xlu1 %v571_v37 }
 0x184   : > { %633 = vadd.xlane.f32.xlu0 %v632_v40 }
 0x186   : > { %636 = vadd.xlane.f32.xlu1 %v635_v43 }
 0x188   : > { %575 = vadd.xlane.f32.xlu0 %v574_v12 }
 0x18a   : > { %578 = vadd.xlane.f32.xlu1 %v577_v46 }
 0x18c   : > { %639 = vadd.xlane.f32.xlu0 %v638_v47 }
 0x18e   : > { %642 = vadd.xlane.f32.xlu1 %v641_v16 }
 0x1dd   : > { %v534_v48 = vpop.xlane.xlu0 %533 }
 0x1de   : > { %v644_v49 = vmul.f32 0.03125, %v534_v48 }
 0x1df   : > { %v598_v51 = vpop.xlane.xlu1 %597 }
 0x1e0   : > { %v676_v53 = vmul.f32 %v644_v49, %v644_v49  ;;  %v660_v54 = vmul.f32 0.03125, %v598_v51  ;;  %v708_v25 = vsub.f32 %v2379_v19, %v644_v49 }
 0x1e1   : > { %v537_v55 = vpop.xlane.xlu0 %536 }
 0x1e2   : > { %v692_v56 = vsub.f32 %v660_v54, %v676_v53  ;;  %v645_v57 = vmul.f32 0.03125, %v537_v55 }
 0x1e3   : > { %v601_v58 = vpop.xlane.xlu1 %600 }
 0x1e4   : > { %v724_v59 = vadd.f32 1e-05, %v692_v56  ;;  %v677_v60 = vmul.f32 %v645_v57, %v645_v57  ;;  %v661_v62 = vmul.f32 0.03125, %v601_v58  ;;  %v709_v38 = vsub.f32 %v2382_v20, %v645_v57 }
 0x1e5   : > { %v540_v1 = vpop.xlane.xlu0 %539 }
 0x1e6   : > { %1931 = vrsqrt.f32 %v724_v59  ;;  %v693_v2 = vsub.f32 %v661_v62, %v677_v60  ;;  %v646_v3 = vmul.f32 0.03125, %v540_v1 }
 0x1e7   : > { %v543_v4 = vpop.xlane.xlu1 %542 }
 0x1e8   : > { %v725_v5 = vadd.f32 1e-05, %v693_v2  ;;  %v647_v6 = vmul.f32 0.03125, %v543_v4  ;;  %v678_v9 = vmul.f32 %v646_v3, %v646_v3  ;;  %v710_v54 = vsub.f32 %v2395_v28, %v646_v3 }
 0x1e9   : > { %v604_v7 = vpop.xlane.xlu0 %603 }
 0x1ea   : > { %1933 = vrsqrt.f32 %v725_v5  ;;  %v662_v10 = vmul.f32 0.03125, %v604_v7  ;;  %v679_v13 = vmul.f32 %v647_v6, %v647_v6  ;;  %v711_v60 = vsub.f32 %v2399_v30, %v647_v6 }
 0x1eb   : > { %v607_v11 = vpop.xlane.xlu1 %606 }
 0x1ec   : > { %v694_v17 = vsub.f32 %v662_v10, %v678_v9  ;;  %v663_v18 = vmul.f32 0.03125, %v607_v11 }
 0x1ed   : > { %v546_v21 = vpop.xlane.xlu0 %545 }
 0x1ee   : > { %v726_v22 = vadd.f32 1e-05, %v694_v17  ;;  %v695_v23 = vsub.f32 %v663_v18, %v679_v13  ;;  %v2528_v24 = vmul.f32 0.03125, %v546_v21 }
 0x1ef   : > { %v549_v26 = vpop.xlane.xlu1 %548 }
 0x1f0   : > { %v1932_v29 = vpop.eup %1931  ;;  %1935 = vrsqrt.f32 %v726_v22  ;;  %v727_v31 = vadd.f32 1e-05, %v695_v23  ;;  %v2531_v32 = vmul.f32 0.03125, %v549_v26  ;;  %v680_v36 = vmul.f32 %v2528_v24, %v2528_v24 }
 0x1f1   : > { %v610_v34 = vpop.xlane.xlu0 %609  ;;  %v756_v35 = vmul.f32 %v1932_v29, %v708_v25  ;;  %v712_v6 = vsub.f32 %v2412_v39, %v2528_v24 }
 0x1f2   : > { %1937 = vrsqrt.f32 %v727_v31  ;;  %v664_v37 = vmul.f32 0.03125, %v610_v34  ;;  %v681_v19 = vmul.f32 %v2531_v32, %v2531_v32  ;;  %v713_v29 = vsub.f32 %v2416_v41, %v2531_v32 }
 0x1f3   : > { %v613_v40 = vpop.xlane.xlu1 %612  ;;  %v772_v43 = vmax.f32 %v756_v35, 0.0 }
 0x1f4   : > { %v1934_v12 = vpop.eup %1933  ;;  %v696_v45 = vsub.f32 %v664_v37, %v680_v36  ;;  %v665_v46 = vmul.f32 0.03125, %v613_v40 }
 0x1f5   : > { %1697 = vmatprep.mubr.msk.f32.mxu1 %vm531_vm3, %v772_v43  ;;  %v552_v15 = vpop.xlane.xlu0 %551  ;;  %v757_v47 = vmul.f32 %v1934_v12, %v709_v38 }
 0x1f6   : > { %v728_v16 = vadd.f32 1e-05, %v696_v45  ;;  %v697_v48 = vsub.f32 %v665_v46, %v681_v19  ;;  %v2539_v49 = vmul.f32 0.03125, %v552_v15 }
 0x1f7   : > { %v555_v51 = vpop.xlane.xlu1 %554  ;;  %v773_v53 = vmax.f32 %v757_v47, 0.0 }
 0x1f8   : > { %1939 = vrsqrt.f32 %v728_v16  ;;  %v729_v20 = vadd.f32 1e-05, %v697_v48  ;;  %v2542_v55 = vmul.f32 0.03125, %v555_v51  ;;  %v682_v58 = vmul.f32 %v2539_v49, %v2539_v49 }
 0x1f9   : > { %1698 = vmatmul.mubr.msk.f32.vlgmr.msra.gmra.mrb[2].mxu1 %vm531_vm3, %v773_v53  ;;  %v616_v56 = vpop.xlane.xlu0 %615  ;;  %v714_v32 = vsub.f32 %v2431_v50, %v2539_v49 }
 0x1fa   : > { %v1936_v57 = vpop.eup %1935  ;;  %1941 = vrsqrt.f32 %v729_v20  ;;  %v666_v59 = vmul.f32 0.03125, %v616_v56  ;;  %v683_v4 = vmul.f32 %v2542_v55, %v2542_v55  ;;  %v715_v53 = vsub.f32 %v2435_v52, %v2542_v55 }
 0x1fb   : > { %v619_v62 = vpop.xlane.xlu1 %618  ;;  %v758_v1 = vmul.f32 %v1936_v57, %v710_v54 }
 0x1fc   : > { %v1938_v2 = vpop.eup %1937  ;;  %v698_v28 = vsub.f32 %v666_v59, %v682_v58  ;;  %v667_v3 = vmul.f32 0.03125, %v619_v62 }
 0x1fd   : > { %v558_v5 = vpop.xlane.xlu0 %557  ;;  %v774_v7 = vmax.f32 %v758_v1, 0.0  ;;  %v759_v9 = vmul.f32 %v1938_v2, %v711_v60 }
 0x1fe   : > { %v730_v10 = vadd.f32 1e-05, %v698_v28  ;;  %v699_v11 = vsub.f32 %v667_v3, %v683_v4  ;;  %v2550_v13 = vmul.f32 0.03125, %v558_v5 }
 0x1ff   : > { %1700 = vmatprep.mubr.msk.f32.mxu1 %vm531_vm3, %v774_v7  ;;  %v561_v17 = vpop.xlane.xlu1 %560  ;;  %v775_v18 = vmax.f32 %v759_v9, 0.0 }
 0x200   : > { %1943 = vrsqrt.f32 %v730_v10  ;;  %v731_v30 = vadd.f32 1e-05, %v699_v11  ;;  %v2555_v21 = vmul.f32 0.03125, %v561_v17  ;;  %v684_v25 = vmul.f32 %v2550_v13, %v2550_v13 }
 0x201   : > { %1701 = vmatmul.mubr.msk.f32.gmra.mrb[4].mxu1 %vm531_vm3, %v775_v18  ;;  %v622_v22 = vpop.xlane.xlu0 %621  ;;  %v716_v55 = vsub.f32 %v2449_v61, %v2550_v13 }
 0x202   : > { %v1940_v23 = vpop.eup %1939  ;;  %1945 = vrsqrt.f32 %v731_v30  ;;  %v668_v26 = vmul.f32 0.03125, %v622_v22  ;;  %v685_v39 = vmul.f32 %v2555_v21, %v2555_v21  ;;  %v717_v11 = vsub.f32 %v2453_v63, %v2555_v21 }
 0x203   : > { %v625_v31 = vpop.xlane.xlu1 %624  ;;  %v760_v34 = vmul.f32 %v1940_v23, %v712_v6 }
 0x204   : > { %v1942_v35 = vpop.eup %1941  ;;  %v700_v24 = vsub.f32 %v668_v26, %v684_v25  ;;  %v669_v36 = vmul.f32 0.03125, %v625_v31 }
 0x205   : > { %v564_v37 = vpop.xlane.xlu0 %563  ;;  %v776_v38 = vmax.f32 %v760_v34, 0.0  ;;  %v761_v40 = vmul.f32 %v1942_v35, %v713_v29 }
 0x206   : > { %v732_v43 = vadd.f32 1e-05, %v700_v24  ;;  %v701_v12 = vsub.f32 %v669_v36, %v685_v39  ;;  %v2564_v19 = vmul.f32 0.03125, %v564_v37 }
 0x207   : > { %1703 = vmatprep.mubr.msk.f32.mxu1 %vm531_vm3, %v776_v38  ;;  %v567_v45 = vpop.xlane.xlu1 %566  ;;  %v777_v46 = vmax.f32 %v761_v40, 0.0 }
 0x208   : > { %1947 = vrsqrt.f32 %v732_v43  ;;  %v733_v41 = vadd.f32 1e-05, %v701_v12  ;;  %v2569_v15 = vmul.f32 0.03125, %v567_v45  ;;  %v686_v48 = vmul.f32 %v2564_v19, %v2564_v19 }
 0x209   : > { %1704 = vmatmul.mubr.msk.f32.gmra.mrb[6].mxu1 %vm531_vm3, %v777_v46  ;;  %v628_v47 = vpop.xlane.xlu0 %627  ;;  %v718_v63 = vsub.f32 %v2466_v8, %v2564_v19 }
 0x20a   : > { %v1944_v16 = vpop.eup %1943  ;;  %1949 = vrsqrt.f32 %v733_v41  ;;  %v670_v51 = vmul.f32 0.03125, %v628_v47  ;;  %v687_v50 = vmul.f32 %v2569_v15, %v2569_v15  ;;  %v719_v40 = vsub.f32 %v2476_v14, %v2569_v15 }
 0x20b   : > { %v631_v20 = vpop.xlane.xlu1 %630  ;;  %v762_v54 = vmul.f32 %v1944_v16, %v714_v32 }
 0x20c   : > { %v1946_v56 = vpop.eup %1945  ;;  %v702_v49 = vsub.f32 %v670_v51, %v686_v48  ;;  %v671_v57 = vmul.f32 0.03125, %v631_v20 }
 0x20d   : > { %v570_v58 = vpop.xlane.xlu0 %569  ;;  %v778_v59 = vmax.f32 %v762_v54, 0.0  ;;  %v763_v60 = vmul.f32 %v1946_v56, %v715_v53 }
 0x20e   : > { %v734_v62 = vadd.f32 1e-05, %v702_v49  ;;  %v703_v1 = vsub.f32 %v671_v57, %v687_v50  ;;  %v656_v2 = vmul.f32 0.03125, %v570_v58 }
 0x20f   : > { %1706 = vmatprep.mubr.msk.f32.mxu1 %vm531_vm3, %v778_v59  ;;  %v573_v4 = vpop.xlane.xlu1 %572  ;;  %v779_v28 = vmax.f32 %v763_v60, 0.0 }
 0x210   : > { %1951 = vrsqrt.f32 %v734_v62  ;;  %v735_v52 = vadd.f32 1e-05, %v703_v1  ;;  %v657_v3 = vmul.f32 0.03125, %v573_v4  ;;  %v688_v9 = vmul.f32 %v656_v2, %v656_v2 }
 0x211   : > { %1707 = vmatmul.mubr.msk.f32.gmra.mrb[8].mxu1 %vm531_vm3, %v779_v28  ;;  %v634_v5 = vpop.xlane.xlu0 %633  ;;  %v720_v53 = vsub.f32 %v2495_v27, %v656_v2 }
 0x212   : > { %v1948_v7 = vpop.eup %1947  ;;  %1953 = vrsqrt.f32 %v735_v52  ;;  %v672_v10 = vmul.f32 0.03125, %v634_v5  ;;  %v689_v6 = vmul.f32 %v657_v3, %v657_v3  ;;  %v721_v15 = vsub.f32 %v2499_v33, %v657_v3 }
 0x213   : > { %v637_v17 = vpop.xlane.xlu1 %636  ;;  %v764_v18 = vmul.f32 %v1948_v7, %v716_v55 }
 0x214   : > { %v1950_v30 = vpop.eup %1949  ;;  %v704_v22 = vsub.f32 %v672_v10, %v688_v9  ;;  %v673_v23 = vmul.f32 0.03125, %v637_v17 }
 0x215   : > { %v576_v25 = vpop.xlane.xlu0 %575  ;;  %v780_v26 = vmax.f32 %v764_v18, 0.0  ;;  %v765_v61 = vmul.f32 %v1950_v30, %v717_v11 }
 0x216   : > { %v736_v13 = vadd.f32 1e-05, %v704_v22  ;;  %v705_v29 = vsub.f32 %v673_v23, %v689_v6  ;;  %v658_v31 = vmul.f32 0.03125, %v576_v25 }
 0x217   : > { %1709 = vmatprep.mubr.msk.f32.mxu1 %vm531_vm3, %v780_v26  ;;  %v579_v34 = vpop.xlane.xlu1 %578  ;;  %v781_v35 = vmax.f32 %v765_v61, 0.0 }
 0x218   : > { %1955 = vrsqrt.f32 %v736_v13  ;;  %v737_v39 = vadd.f32 1e-05, %v705_v29  ;;  %v659_v21 = vmul.f32 0.03125, %v579_v34  ;;  %v690_v37 = vmul.f32 %v658_v31, %v658_v31 }
 0x219   : > { %1710 = vmatmul.mubr.msk.f32.gmra.mrb[10].mxu1 %vm531_vm3, %v781_v35  ;;  %v640_v24 = vpop.xlane.xlu0 %639  ;;  %v722_v57 = vsub.f32 %v2512_v42, %v658_v31  ;;  %v2605_v42 = vld [vmem:[%s2889_s4] ss:$0 sm:$0xff] }
 0x21a   : > { %v1952_v36 = vpop.eup %1951  ;;  %1957 = vrsqrt.f32 %v737_v39  ;;  %v674_v38 = vmul.f32 0.03125, %v640_v24  ;;  %v691_v46 = vmul.f32 %v659_v21, %v659_v21  ;;  %v723_v27 = vsub.f32 %v2516_v44, %v659_v21 }
 0x21b   : > { %v643_v43 = vpop.xlane.xlu1 %642  ;;  %v766_v12 = vmul.f32 %v1952_v36, %v718_v63 }
 0x21c   : > { %v1954_v45 = vpop.eup %1953  ;;  %v706_v41 = vsub.f32 %v674_v38, %v690_v37  ;;  %v675_v32 = vmul.f32 0.03125, %v643_v43 }
 0x21d   : > { %v782_v47 = vmax.f32 %v766_v12, 0.0  ;;  %v767_v16 = vmul.f32 %v1954_v45, %v719_v40 }
 0x21e   : > { %v738_v8 = vadd.f32 1e-05, %v706_v41  ;;  %v707_v19 = vsub.f32 %v675_v32, %v691_v46 }
 0x21f   : > { %1712 = vmatprep.mubr.msk.f32.mxu1 %vm531_vm3, %v782_v47  ;;  %v783_v48 = vmax.f32 %v767_v16, 0.0 }
 0x220   : > { %1959 = vrsqrt.f32 %v738_v8  ;;  %v739_v51 = vadd.f32 1e-05, %v707_v19 }
 0x221   : > { %1713 = vmatmul.mubr.msk.f32.gmra.mrb[12].mxu1 %vm531_vm3, %v783_v48 }
 0x222   : > { %v1956_v14 = vpop.eup %1955  ;;  %1961 = vrsqrt.f32 %v739_v51 }
 0x223   : > { %v768_v20 = vmul.f32 %v1956_v14, %v720_v53 }
 0x224   : > { %v1958_v54 = vpop.eup %1957 }
 0x225   : > { %v784_v56 = vmax.f32 %v768_v20, 0.0  ;;  %v769_v50 = vmul.f32 %v1958_v54, %v721_v15 }
 0x227   : > { %1715 = vmatprep.mubr.msk.f32.mxu1 %vm531_vm3, %v784_v56  ;;  %v785_v49 = vmax.f32 %v769_v50, 0.0 }
 0x229   : > { %1716 = vmatmul.mubr.msk.f32.gmra.mrb[14].mxu1 %vm531_vm3, %v785_v49 }
 0x22a   : > { %v1960_v58 = vpop.eup %1959 }
 0x22b   : > { %v770_v59 = vmul.f32 %v1960_v58, %v722_v57 }
 0x22c   : > { %v1962_v60 = vpop.eup %1961 }
 0x22d   : > { %v786_v62 = vmax.f32 %v770_v59, 0.0  ;;  %v771_v1 = vmul.f32 %v1962_v60, %v723_v27  ;;  %v2165_v59 = vmov 0.0|0.0  }
 0x22e   : > { %1799 = vmatprep.subr.bf16.mxu0 %v2165_v59  ;;  %1831 = vmatprep.subr.bf16.mxu1 %v2165_v59 }
 0x22f   : > { %1718 = vmatprep.mubr.msk.f32.mxu1 %vm531_vm3, %v786_v62  ;;  %v787_v33 = vmax.f32 %v771_v1, 0.0 }
 0x231   : > { %1719 = vmatmul.mubr.msk.f32.gmra.mrb[16].mxu1 %vm531_vm3, %v787_v33 }
 0x232   : > { %1788 = vmatprep.mubr.msk.f32.mxu1 %vm2163_vm0, %v2162_v0 }
 0x2cc   : > { %v1699_v2 = vpop.f32.mrb[2].mxu1 }
 0x2cd   : > { %v2608_v44 = vadd.f32 %v1699_v2, %v2605_v42  ;;  %v913_v4 = vpop.f32.mrb[3].mxu1 }
 0x2ce   : > { %v2611_v28 = vadd.f32 %v2605_v42, %v913_v4 }
 0x2cf   : > { %v995_v52 = vsel %vm531_vm3, %v2608_v44, 0.0  ;;  %v1041_v55 = vmul.f32 %v2608_v44, %v2608_v44 }
 0x2d0   : > { %996 = vadd.xlane.f32.xlu1 %v995_v52  ;;  %v992_v0 = vsel %vm531_vm3, %v2611_v28, 0.0  ;;  %v1040_v3 = vmul.f32 %v2611_v28, %v2611_v28 }
 0x2d1   : > { %993 = vadd.xlane.f32.xlu0 %v992_v0  ;;  %v1059_v5 = vsel %vm531_vm3, %v1041_v55, 0.0 }
 0x2d2   : > { %v1056_v9 = vsel %vm531_vm3, %v1040_v3, 0.0 }
 0x2d4   : > { %1060 = vadd.xlane.f32.xlu1 %v1059_v5  ;;  %v1702_v7 = vpop.f32.mrb[4].mxu1 }
 0x2d5   : > { %v2624_v10 = vadd.f32 %v1702_v7, %v2605_v42  ;;  %v923_v11 = vpop.f32.mrb[5].mxu1  ;;  %1057 = vadd.xlane.f32.xlu0 %v1056_v9 }
 0x2d6   : > { %v2627_v17 = vadd.f32 %v2605_v42, %v923_v11 }
 0x2d7   : > { %v1001_v18 = vsel %vm531_vm3, %v2624_v10, 0.0  ;;  %v1043_v30 = vmul.f32 %v2624_v10, %v2624_v10 }
 0x2d8   : > { %1002 = vadd.xlane.f32.xlu1 %v1001_v18  ;;  %v998_v6 = vsel %vm531_vm3, %v2627_v17, 0.0  ;;  %v1042_v22 = vmul.f32 %v2627_v17, %v2627_v17 }
 0x2d9   : > { %999 = vadd.xlane.f32.xlu0 %v998_v6  ;;  %v1065_v23 = vsel %vm531_vm3, %v1043_v30, 0.0 }
 0x2da   : > { %v1062_v26 = vsel %vm531_vm3, %v1042_v22, 0.0 }
 0x2dc   : > { %1066 = vadd.xlane.f32.xlu1 %v1065_v23  ;;  %v1705_v25 = vpop.f32.mrb[6].mxu1 }
 0x2dd   : > { %v2640_v61 = vadd.f32 %v1705_v25, %v2605_v42  ;;  %v933_v13 = vpop.f32.mrb[7].mxu1  ;;  %1063 = vadd.xlane.f32.xlu0 %v1062_v26 }
 0x2de   : > { %v2643_v29 = vadd.f32 %v2605_v42, %v933_v13 }
 0x2df   : > { %v1007_v31 = vsel %vm531_vm3, %v2640_v61, 0.0  ;;  %v1045_v34 = vmul.f32 %v2640_v61, %v2640_v61 }
 0x2e0   : > { %1008 = vadd.xlane.f32.xlu1 %v1007_v31  ;;  %v1004_v35 = vsel %vm531_vm3, %v2643_v29, 0.0  ;;  %v1044_v39 = vmul.f32 %v2643_v29, %v2643_v29 }
 0x2e1   : > { %1005 = vadd.xlane.f32.xlu0 %v1004_v35  ;;  %v1071_v63 = vsel %vm531_vm3, %v1045_v34, 0.0 }
 0x2e2   : > { %v1068_v24 = vsel %vm531_vm3, %v1044_v39, 0.0 }
 0x2e4   : > { %1072 = vadd.xlane.f32.xlu1 %v1071_v63  ;;  %v1708_v21 = vpop.f32.mrb[8].mxu1 }
 0x2e5   : > { %v2656_v36 = vadd.f32 %v1708_v21, %v2605_v42  ;;  %v943_v37 = vpop.f32.mrb[9].mxu1  ;;  %1069 = vadd.xlane.f32.xlu0 %v1068_v24 }
 0x2e6   : > { %v2659_v38 = vadd.f32 %v2605_v42, %v943_v37 }
 0x2e7   : > { %v1013_v40 = vsel %vm531_vm3, %v2656_v36, 0.0  ;;  %v1047_v43 = vmul.f32 %v2656_v36, %v2656_v36 }
 0x2e8   : > { %1014 = vadd.xlane.f32.xlu1 %v1013_v40  ;;  %v1010_v12 = vsel %vm531_vm3, %v2659_v38, 0.0  ;;  %v1046_v45 = vmul.f32 %v2659_v38, %v2659_v38 }
 0x2e9   : > { %1011 = vadd.xlane.f32.xlu0 %v1010_v12  ;;  %v1077_v46 = vsel %vm531_vm3, %v1047_v43, 0.0 }
 0x2ea   : > { %v1074_v32 = vsel %vm531_vm3, %v1046_v45, 0.0 }
 0x2ec   : > { %1078 = vadd.xlane.f32.xlu1 %v1077_v46  ;;  %v1711_v41 = vpop.f32.mrb[10].mxu1 }
 0x2ed   : > { %v2672_v47 = vadd.f32 %v1711_v41, %v2605_v42  ;;  %v953_v16 = vpop.f32.mrb[11].mxu1  ;;  %1075 = vadd.xlane.f32.xlu0 %v1074_v32 }
 0x2ee   : > { %v2675_v8 = vadd.f32 %v2605_v42, %v953_v16 }
 0x2ef   : > { %v1019_v19 = vsel %vm531_vm3, %v2672_v47, 0.0  ;;  %v1049_v48 = vmul.f32 %v2672_v47, %v2672_v47 }
 0x2f0   : > { %1020 = vadd.xlane.f32.xlu1 %v1019_v19  ;;  %v1016_v51 = vsel %vm531_vm3, %v2675_v8, 0.0  ;;  %v1048_v53 = vmul.f32 %v2675_v8, %v2675_v8 }
 0x2f1   : > { %1017 = vadd.xlane.f32.xlu0 %v1016_v51  ;;  %v1083_v14 = vsel %vm531_vm3, %v1049_v48, 0.0 }
 0x2f2   : > { %v1080_v20 = vsel %vm531_vm3, %v1048_v53, 0.0 }
 0x2f4   : > { %1084 = vadd.xlane.f32.xlu1 %v1083_v14  ;;  %v1714_v15 = vpop.f32.mrb[12].mxu1 }
 0x2f5   : > { %v2688_v54 = vadd.f32 %v1714_v15, %v2605_v42  ;;  %v963_v56 = vpop.f32.mrb[13].mxu1  ;;  %1081 = vadd.xlane.f32.xlu0 %v1080_v20 }
 0x2f6   : > { %v2691_v50 = vadd.f32 %v2605_v42, %v963_v56 }
 0x2f7   : > { %v1025_v49 = vsel %vm531_vm3, %v2688_v54, 0.0  ;;  %v1051_v57 = vmul.f32 %v2688_v54, %v2688_v54 }
 0x2f8   : > { %1026 = vadd.xlane.f32.xlu1 %v1025_v49  ;;  %v1022_v58 = vsel %vm531_vm3, %v2691_v50, 0.0  ;;  %v1050_v27 = vmul.f32 %v2691_v50, %v2691_v50 }
 0x2f9   : > { %1023 = vadd.xlane.f32.xlu0 %v1022_v58  ;;  %v1089_v60 = vsel %vm531_vm3, %v1051_v57, 0.0 }
 0x2fa   : > { %v1086_v1 = vsel %vm531_vm3, %v1050_v27, 0.0 }
 0x2fc   : > { %1090 = vadd.xlane.f32.xlu1 %v1089_v60  ;;  %v1717_v62 = vpop.f32.mrb[14].mxu1 }
 0x2fd   : > { %v2706_v33 = vadd.f32 %v1717_v62, %v2605_v42  ;;  %v973_v2 = vpop.f32.mrb[15].mxu1  ;;  %1087 = vadd.xlane.f32.xlu0 %v1086_v1 }
 0x2fe   : > { %v2709_v4 = vadd.f32 %v2605_v42, %v973_v2 }
 0x2ff   : > { %v1031_v52 = vsel %vm531_vm3, %v2706_v33, 0.0  ;;  %v1053_v55 = vmul.f32 %v2706_v33, %v2706_v33 }
 0x300   : > { %1032 = vadd.xlane.f32.xlu1 %v1031_v52  ;;  %v1028_v0 = vsel %vm531_vm3, %v2709_v4, 0.0  ;;  %v1052_v3 = vmul.f32 %v2709_v4, %v2709_v4 }
 0x301   : > { %1029 = vadd.xlane.f32.xlu0 %v1028_v0  ;;  %v1095_v5 = vsel %vm531_vm3, %v1053_v55, 0.0 }
 0x302   : > { %v1092_v9 = vsel %vm531_vm3, %v1052_v3, 0.0 }
 0x304   : > { %1096 = vadd.xlane.f32.xlu1 %v1095_v5  ;;  %v1720_v7 = vpop.f32.mrb[16].mxu1 }
 0x305   : > { %v2722_v11 = vadd.f32 %v1720_v7, %v2605_v42  ;;  %v983_v18 = vpop.f32.mrb[17].mxu1  ;;  %1093 = vadd.xlane.f32.xlu0 %v1092_v9 }
 0x306   : > { %v2725_v30 = vadd.f32 %v2605_v42, %v983_v18 }
 0x307   : > { %v1037_v6 = vsel %vm531_vm3, %v2722_v11, 0.0  ;;  %v1055_v22 = vmul.f32 %v2722_v11, %v2722_v11 }
 0x308   : > { %1038 = vadd.xlane.f32.xlu1 %v1037_v6  ;;  %v1034_v23 = vsel %vm531_vm3, %v2725_v30, 0.0  ;;  %v1054_v25 = vmul.f32 %v2725_v30, %v2725_v30 }
 0x309   : > { %1035 = vadd.xlane.f32.xlu0 %v1034_v23  ;;  %v1101_v26 = vsel %vm531_vm3, %v1055_v22, 0.0 }
 0x30a   : > { %v1098_v42 = vsel %vm531_vm3, %v1054_v25, 0.0 }
 0x30c   : > { %1102 = vadd.xlane.f32.xlu1 %v1101_v26 }
 0x30d   : > { %1099 = vadd.xlane.f32.xlu0 %v1098_v42 }
 0x35d   : > { %v997_v13 = vpop.xlane.xlu1 %996 }
 0x35e   : > { %v1105_v31 = vmul.f32 0.03125, %v997_v13  ;;  %v994_v34 = vpop.xlane.xlu0 %993 }
 0x35f   : > { %v1104_v35 = vmul.f32 0.03125, %v994_v34 }
 0x360   : > { %v1137_v63 = vmul.f32 %v1105_v31, %v1105_v31  ;;  %v1169_v2 = vsub.f32 %v2608_v44, %v1105_v31 }
 0x361   : > { %v1061_v39 = vpop.xlane.xlu1 %1060  ;;  %v1136_v37 = vmul.f32 %v1104_v35, %v1104_v35  ;;  %v1168_v0 = vsub.f32 %v2611_v28, %v1104_v35 }
 0x362   : > { %v1121_v21 = vmul.f32 0.03125, %v1061_v39  ;;  %v1058_v24 = vpop.xlane.xlu0 %1057 }
 0x363   : > { %v1120_v40 = vmul.f32 0.03125, %v1058_v24 }
 0x364   : > { %v1153_v43 = vsub.f32 %v1121_v21, %v1137_v63 }
 0x365   : > { %v1152_v12 = vsub.f32 %v1120_v40, %v1136_v37  ;;  %v1003_v45 = vpop.xlane.xlu1 %1002 }
 0x366   : > { %v1185_v46 = vadd.f32 1e-05, %v1153_v43  ;;  %v1107_v41 = vmul.f32 0.03125, %v1003_v45  ;;  %v1000_v32 = vpop.xlane.xlu0 %999 }
 0x367   : > { %v1184_v16 = vadd.f32 1e-05, %v1152_v12  ;;  %v1106_v19 = vmul.f32 0.03125, %v1000_v32 }
 0x368   : > { %1963 = vrsqrt.f32 %v1185_v46  ;;  %v1139_v51 = vmul.f32 %v1107_v41, %v1107_v41  ;;  %v1171_v24 = vsub.f32 %v2624_v10, %v1107_v41 }
 0x369   : > { %1965 = vrsqrt.f32 %v1184_v16  ;;  %v1067_v48 = vpop.xlane.xlu1 %1066  ;;  %v1138_v15 = vmul.f32 %v1106_v19, %v1106_v19  ;;  %v1170_v43 = vsub.f32 %v2627_v17, %v1106_v19 }
 0x36a   : > { %v1123_v53 = vmul.f32 0.03125, %v1067_v48  ;;  %v1064_v14 = vpop.xlane.xlu0 %1063 }
 0x36b   : > { %v1122_v20 = vmul.f32 0.03125, %v1064_v14 }
 0x36c   : > { %v1155_v56 = vsub.f32 %v1123_v53, %v1139_v51 }
 0x36d   : > { %v1154_v49 = vsub.f32 %v1122_v20, %v1138_v15  ;;  %v1009_v57 = vpop.xlane.xlu1 %1008 }
 0x36e   : > { %v1187_v58 = vadd.f32 1e-05, %v1155_v56  ;;  %v2737_v27 = vmul.f32 0.03125, %v1009_v57  ;;  %v1006_v60 = vpop.xlane.xlu0 %1005 }
 0x36f   : > { %v1186_v62 = vadd.f32 1e-05, %v1154_v49  ;;  %v2739_v1 = vmul.f32 0.03125, %v1006_v60 }
 0x370   : > { %1967 = vrsqrt.f32 %v1187_v58  ;;  %v1141_v3 = vmul.f32 %v2737_v27, %v2737_v27  ;;  %v1173_v60 = vsub.f32 %v2640_v61, %v2737_v27 }
 0x371   : > { %1969 = vrsqrt.f32 %v1186_v62  ;;  %v1073_v52 = vpop.xlane.xlu1 %1072  ;;  %v1140_v18 = vmul.f32 %v2739_v1, %v2739_v1 }
 0x372   : > { %v1964_v55 = vpop.eup %1963  ;;  %v1125_v5 = vmul.f32 0.03125, %v1073_v52  ;;  %v1070_v7 = vpop.xlane.xlu0 %1069  ;;  %v1172_v52 = vsub.f32 %v2643_v29, %v2739_v1 }
 0x373   : > { %v1966_v9 = vpop.eup %1965  ;;  %v1124_v6 = vmul.f32 0.03125, %v1070_v7  ;;  %v1217_v22 = vmul.f32 %v1964_v55, %v1169_v2 }
 0x374   : > { %v1157_v23 = vsub.f32 %v1125_v5, %v1141_v3  ;;  %v1216_v25 = vmul.f32 %v1966_v9, %v1168_v0 }
 0x375   : > { %v1156_v26 = vsub.f32 %v1124_v6, %v1140_v18  ;;  %v1015_v44 = vpop.xlane.xlu1 %1014  ;;  %v1233_v42 = vmax.f32 %v1217_v22, 0.0 }
 0x376   : > { %v1189_v13 = vadd.f32 1e-05, %v1157_v23  ;;  %v2747_v31 = vmul.f32 0.03125, %v1015_v44  ;;  %v1012_v28 = vpop.xlane.xlu0 %1011  ;;  %v1232_v34 = vmax.f32 %v1216_v25, 0.0 }
 0x377   : > { %v1188_v35 = vadd.f32 1e-05, %v1156_v26  ;;  %v2749_v39 = vmul.f32 0.03125, %v1012_v28 }
 0x378   : > { %1971 = vrsqrt.f32 %v1189_v13  ;;  %v1800_v21 = vpack.c.bf16 %v1233_v42, %v1232_v34  ;;  %v1143_v12 = vmul.f32 %v2747_v31, %v2747_v31  ;;  %v1175_v28 = vsub.f32 %v2656_v36, %v2747_v31 }
 0x379   : > { %1973 = vrsqrt.f32 %v1188_v35  ;;  %v1079_v37 = vpop.xlane.xlu1 %1078  ;;  %v1142_v16 = vmul.f32 %v2749_v39, %v2749_v39 }
 0x37a   : > { %v1968_v40 = vpop.eup %1967  ;;  %v1127_v45 = vmul.f32 0.03125, %v1079_v37  ;;  %1802 = vmatpush3.bf16.xpose.msk.msra.mxu0 %vm2753_vm4, %v1800_v21  ;;  %v1076_v46 = vpop.xlane.xlu0 %1075  ;;  %v1174_v21 = vsub.f32 %v2659_v38, %v2749_v39 }
 0x37b   : > { %v1970_v32 = vpop.eup %1969  ;;  %v1126_v48 = vmul.f32 0.03125, %v1076_v46  ;;  %1803 = vmatprep.subr.bf16.mxu0 %v2165_v59  ;;  %v1219_v10 = vmul.f32 %v1968_v40, %v1171_v24 }
 0x37c   : > { %v1159_v41 = vsub.f32 %v1127_v45, %v1143_v12  ;;  %v1218_v51 = vmul.f32 %v1970_v32, %v1170_v43 }
 0x37d   : > { %v1158_v53 = vsub.f32 %v1126_v48, %v1142_v16  ;;  %v1021_v17 = vpop.xlane.xlu1 %1020  ;;  %v1235_v19 = vmax.f32 %v1219_v10, 0.0 }
 0x37e   : > { %v1191_v14 = vadd.f32 1e-05, %v1159_v41  ;;  %v2766_v15 = vmul.f32 0.03125, %v1021_v17  ;;  %v1018_v20 = vpop.xlane.xlu0 %1017  ;;  %v1234_v56 = vmax.f32 %v1218_v51, 0.0 }
 0x37f   : > { %v1190_v49 = vadd.f32 1e-05, %v1158_v53  ;;  %v2768_v57 = vmul.f32 0.03125, %v1018_v20 }
 0x380   : > { %1975 = vrsqrt.f32 %v1191_v14  ;;  %v1804_v58 = vpack.c.bf16 %v1235_v19, %v1234_v56  ;;  %v1145_v55 = vmul.f32 %v2766_v15, %v2766_v15  ;;  %v1177_v19 = vsub.f32 %v2672_v47, %v2766_v15 }
 0x381   : > { %1977 = vrsqrt.f32 %v1190_v49  ;;  %v1085_v62 = vpop.xlane.xlu1 %1084  ;;  %v1144_v7 = vmul.f32 %v2768_v57, %v2768_v57  ;;  %v1176_v56 = vsub.f32 %v2675_v8, %v2768_v57 }
 0x382   : > { %v1972_v2 = vpop.eup %1971  ;;  %v1129_v0 = vmul.f32 0.03125, %v1085_v62  ;;  %1806 = vmatpush3.bf16.xpose.msk.msra.mxu0 %vm2753_vm4, %v1804_v58  ;;  %v1082_v3 = vpop.xlane.xlu0 %1081 }
 0x383   : > { %v1974_v5 = vpop.eup %1973  ;;  %v1128_v9 = vmul.f32 0.03125, %v1082_v3  ;;  %1807 = vmatprep.subr.bf16.mxu0 %v2165_v59  ;;  %v1221_v61 = vmul.f32 %v1972_v2, %v1173_v60 }
 0x384   : > { %v1161_v27 = vsub.f32 %v1129_v0, %v1145_v55  ;;  %v1220_v18 = vmul.f32 %v1974_v5, %v1172_v52 }
 0x385   : > { %v1160_v6 = vsub.f32 %v1128_v9, %v1144_v7  ;;  %v1027_v29 = vpop.xlane.xlu1 %1026  ;;  %v1237_v1 = vmax.f32 %v1221_v61, 0.0 }
 0x386   : > { %v1193_v22 = vadd.f32 1e-05, %v1161_v27  ;;  %v2781_v23 = vmul.f32 0.03125, %v1027_v29  ;;  %v1024_v25 = vpop.xlane.xlu0 %1023  ;;  %v1236_v26 = vmax.f32 %v1220_v18, 0.0 }
 0x387   : > { %v1192_v44 = vadd.f32 1e-05, %v1160_v6  ;;  %v2783_v42 = vmul.f32 0.03125, %v1024_v25 }
 0x388   : > { %1979 = vrsqrt.f32 %v1193_v22  ;;  %v1808_v13 = vpack.c.bf16 %v1237_v1, %v1236_v26  ;;  %v1147_v24 = vmul.f32 %v2781_v23, %v2781_v23  ;;  %v1179_v6 = vsub.f32 %v2688_v54, %v2781_v23 }
 0x389   : > { %1981 = vrsqrt.f32 %v1192_v44  ;;  %v1091_v34 = vpop.xlane.xlu1 %1090  ;;  %v1146_v12 = vmul.f32 %v2783_v42, %v2783_v42  ;;  %v1178_v22 = vsub.f32 %v2691_v50, %v2783_v42 }
 0x38a   : > { %v1976_v35 = vpop.eup %1975  ;;  %v1131_v37 = vmul.f32 0.03125, %v1091_v34  ;;  %1810 = vmatpush3.bf16.xpose.msk.msra.mxu0 %vm2753_vm4, %v1808_v13  ;;  %v1088_v40 = vpop.xlane.xlu0 %1087 }
 0x38b   : > { %v1978_v43 = vpop.eup %1977  ;;  %v1130_v45 = vmul.f32 0.03125, %v1088_v40  ;;  %1811 = vmatprep.subr.bf16.mxu0 %v2165_v59  ;;  %v1223_v36 = vmul.f32 %v1976_v35, %v1175_v28 }
 0x38c   : > { %v1163_v31 = vsub.f32 %v1131_v37, %v1147_v24  ;;  %v1222_v46 = vmul.f32 %v1978_v43, %v1174_v21 }
 0x38d   : > { %v1162_v32 = vsub.f32 %v1130_v45, %v1146_v12  ;;  %v1033_v38 = vpop.xlane.xlu1 %1032  ;;  %v1239_v39 = vmax.f32 %v1223_v36, 0.0 }
 0x38e   : > { %v1195_v16 = vadd.f32 1e-05, %v1163_v31  ;;  %v2796_v48 = vmul.f32 0.03125, %v1033_v38  ;;  %v1030_v10 = vpop.xlane.xlu0 %1029  ;;  %v1238_v41 = vmax.f32 %v1222_v46, 0.0 }
 0x38f   : > { %v1194_v51 = vadd.f32 1e-05, %v1162_v32  ;;  %v1116_v53 = vmul.f32 0.03125, %v1030_v10 }
 0x390   : > { %1983 = vrsqrt.f32 %v1195_v16  ;;  %v1812_v17 = vpack.c.bf16 %v1239_v39, %v1238_v41  ;;  %v1149_v49 = vmul.f32 %v2796_v48, %v2796_v48  ;;  %v1181_v42 = vsub.f32 %v2706_v33, %v2796_v48 }
 0x391   : > { %1985 = vrsqrt.f32 %v1194_v51  ;;  %v1097_v14 = vpop.xlane.xlu1 %1096  ;;  %v1148_v2 = vmul.f32 %v1116_v53, %v1116_v53  ;;  %v1180_v45 = vsub.f32 %v2709_v4, %v1116_v53 }
 0x392   : > { %v1980_v20 = vpop.eup %1979  ;;  %v1133_v58 = vmul.f32 0.03125, %v1097_v14  ;;  %1814 = vmatpush3.bf16.xpose.msk.msra.mxu0 %vm2753_vm4, %v1812_v17  ;;  %v1094_v60 = vpop.xlane.xlu0 %1093  ;;  %v1392_v14 = vld [vmem:[#allocation8 + $0x10] sm:$0xff] }
 0x393   : > { %v1982_v62 = vpop.eup %1981  ;;  %v1132_v52 = vmul.f32 0.03125, %v1094_v60  ;;  %1815 = vmatprep.subr.bf16.mxu0 %v2165_v59  ;;  %v1225_v47 = vmul.f32 %v1980_v20, %v1177_v19  ;;  %v1391_v19 = vld [vmem:[#allocation8 + $0x8] sm:$0xff] }
 0x394   : > { %v1165_v15 = vsub.f32 %v1133_v58, %v1149_v49  ;;  %v1224_v55 = vmul.f32 %v1982_v62, %v1176_v56  ;;  %v1393_v56 = vld [vmem:[#allocation8 + $0x18] sm:$0xff]  ;;  %v1394_v58 = vld [vmem:[#allocation8 + $0x20] sm:$0xff]  ;;  %v1395_v60 = vld [vmem:[#allocation8 + $0x28] sm:$0xff] }
 0x395   : > { %v1164_v0 = vsub.f32 %v1132_v52, %v1148_v2  ;;  %v1039_v3 = vpop.xlane.xlu1 %1038  ;;  %v1241_v5 = vmax.f32 %v1225_v47, 0.0  ;;  %v1835_v49 = vpack.c.bf16 %v1393_v56, %v1392_v14  ;;  %v1838_v63 = vpack.c.bf16 %v1395_v60, %v1394_v58  ;;  %v1396_v62 = vld [vmem:[#allocation8 + $0x30] sm:$0xff]  ;;  %v1397_v2 = vld [vmem:[#allocation8 + $0x38] sm:$0xff]  ;;  %v1398_v47 = vld [vmem:[#allocation8 + $0x40] sm:$0xff] }
 0x396   : > { %v1197_v8 = vadd.f32 1e-05, %v1165_v15  ;;  %v1119_v57 = vmul.f32 0.03125, %v1039_v3  ;;  %v1036_v7 = vpop.xlane.xlu0 %1035  ;;  %v1240_v9 = vmax.f32 %v1224_v55, 0.0  ;;  %v1841_v52 = vpack.c.bf16 %v1397_v2, %v1396_v62  ;;  %v1399_v15 = vld [vmem:[#allocation8 + $0x48] sm:$0xff]  ;;  %v1401_v3 = vld [vmem:[#allocation8 + $0x58] sm:$0xff] }
 0x397   : > { %v1196_v61 = vadd.f32 1e-05, %v1164_v0  ;;  %v1118_v27 = vmul.f32 0.03125, %v1036_v7  ;;  %v1844_v55 = vpack.c.bf16 %v1399_v15, %v1398_v47  ;;  %v1400_v0 = vld [vmem:[#allocation8 + $0x50] sm:$0xff] }
 0x398   : > { %1987 = vrsqrt.f32 %v1197_v8  ;;  %v1816_v18 = vpack.c.bf16 %v1241_v5, %v1240_v9  ;;  %v1151_v25 = vmul.f32 %v1119_v57, %v1119_v57  ;;  %v1183_v16 = vsub.f32 %v2722_v11, %v1119_v57  ;;  %v1248_v11 = vld [vmem:[%s2890_s5] sm:$0x1]  ;;  %v1402_v8 = vld [vmem:[#allocation8 + $0x60] sm:$0xff]  ;;  %v1404_v9 = vld [vmem:[#allocation8 + $0x70] sm:$0xff] }
 0x399   : > { %1989 = vrsqrt.f32 %v1196_v61  ;;  %v1103_v29 = vpop.xlane.xlu1 %1102  ;;  %v1150_v28 = vmul.f32 %v1118_v27, %v1118_v27  ;;  %v1182_v33 = vsub.f32 %v2725_v30, %v1118_v27  ;;  %v1390_v30 = vld [vmem:[#allocation8] sm:$0xff]  ;;  %v1847_v5 = vpack.c.bf16 %v1401_v3, %v1400_v0  ;;  %v1403_v57 = vld [vmem:[#allocation8 + $0x68] sm:$0xff]  ;;  %v1405_v61 = vld [vmem:[#allocation8 + $0x78] sm:$0xff] }
 0x39a   : > { %v1984_v1 = vpop.eup %1983  ;;  %v1135_v26 = vmul.f32 0.03125, %v1103_v29  ;;  %1818 = vmatpush3.bf16.xpose.msk.msra.mxu0 %vm2753_vm4, %v1816_v18  ;;  %v1100_v44 = vpop.xlane.xlu0 %1099  ;;  %v1832_v20 = vpack.c.bf16 %v1391_v19, %v1390_v30  ;;  %v1850_v7 = vpack.c.bf16 %v1403_v57, %v1402_v8  ;;  %v1853_v27 = vpack.c.bf16 %v1405_v61, %v1404_v9 }
 0x39b   : > { %v1986_v13 = vpop.eup %1985  ;;  %v1134_v34 = vmul.f32 0.03125, %v1100_v44  ;;  %1819 = vmatprep.subr.bf16.mxu0 %v2165_v59  ;;  %v1227_v35 = vmul.f32 %v1984_v1, %v1179_v6  ;;  %v1250_v18 = vstv %s1249_s18 }
 0x39c   : > { %v1167_v21 = vsub.f32 %v1135_v26, %v1151_v25  ;;  %v1226_v54 = vmul.f32 %v1986_v13, %v1178_v22  ;;  %1833 = vmatpush3.bf16.msra.mxu1 %v1832_v20 }
 0x39d   : > { %v1166_v23 = vsub.f32 %v1134_v34, %v1150_v28  ;;  %v1243_v24 = vmax.f32 %v1227_v35, 0.0  ;;  %1834 = vmatprep.subr.bf16.mxu1 %v2165_v59 }
 0x39e   : > { %v1199_v37 = vadd.f32 1e-05, %v1167_v21  ;;  %v1242_v40 = vmax.f32 %v1226_v54, 0.0 }
 0x39f   : > { %v1198_v43 = vadd.f32 1e-05, %v1166_v23 }
 0x3a0   : > { %1991 = vrsqrt.f32 %v1199_v37  ;;  %v1820_v50 = vpack.c.bf16 %v1243_v24, %v1242_v40  ;;  %1836 = vmatpush3.bf16.msra.mxu1 %v1835_v49 }
 0x3a1   : > { %1993 = vrsqrt.f32 %v1198_v43  ;;  %1837 = vmatprep.subr.bf16.mxu1 %v2165_v59 }
 0x3a2   : > { %v1988_v12 = vpop.eup %1987  ;;  %1822 = vmatpush3.bf16.xpose.msk.msra.mxu0 %vm2753_vm4, %v1820_v50 }
 0x3a3   : > { %v1990_v36 = vpop.eup %1989  ;;  %1823 = vmatprep.subr.bf16.mxu0 %v2165_v59  ;;  %v1229_v31 = vmul.f32 %v1988_v12, %v1181_v42 }
 0x3a4   : > { %v1228_v46 = vmul.f32 %v1990_v36, %v1180_v45  ;;  %1839 = vmatpush3.bf16.msra.mxu1 %v1838_v63 }
 0x3a5   : > { %v1245_v32 = vmax.f32 %v1229_v31, 0.0  ;;  %1840 = vmatprep.subr.bf16.mxu1 %v2165_v59 }
 0x3a6   : > { %v1244_v38 = vmax.f32 %v1228_v46, 0.0 }
 0x3a8   : > { %v1824_v39 = vpack.c.bf16 %v1245_v32, %v1244_v38  ;;  %1842 = vmatpush3.bf16.msra.mxu1 %v1841_v52 }
 0x3a9   : > { %1843 = vmatprep.subr.bf16.mxu1 %v2165_v59 }
 0x3aa   : > { %v1992_v10 = vpop.eup %1991  ;;  %1826 = vmatpush3.bf16.xpose.msk.msra.mxu0 %vm2753_vm4, %v1824_v39 }
 0x3ab   : > { %v1994_v4 = vpop.eup %1993  ;;  %1827 = vmatprep.subr.bf16.mxu0 %v2165_v59  ;;  %v1231_v48 = vmul.f32 %v1992_v10, %v1183_v16 }
 0x3ac   : > { %v1230_v41 = vmul.f32 %v1994_v4, %v1182_v33  ;;  %1845 = vmatpush3.bf16.msra.mxu1 %v1844_v55 }
 0x3ad   : > { %v1247_v51 = vmax.f32 %v1231_v48, 0.0  ;;  %1846 = vmatprep.subr.bf16.mxu1 %v2165_v59 }
 0x3ae   : > { %v1246_v53 = vmax.f32 %v1230_v41, 0.0 }
 0x3b0   : > { %v1828_v17 = vpack.c.bf16 %v1247_v51, %v1246_v53  ;;  %1848 = vmatpush3.bf16.msra.mxu1 %v1847_v5 }
 0x3b1   : > { %1849 = vmatprep.subr.bf16.mxu1 %v2165_v59 }
 0x3b2   : > { %1830 = vmatpush3.bf16.xpose.msk.msra.mxu0 %vm2753_vm4, %v1828_v17 }
 0x3b4   : > { %1851 = vmatpush3.bf16.msra.mxu1 %v1850_v7 }
 0x3b5   : > { %1852 = vmatprep.subr.bf16.mxu1 %v2165_v59 }
 0x3b8   : > { %1854 = vmatpush3.bf16.msra.mxu1 %v1853_v27 }
 0x3b9   : > { %1754 = vmatmul.mubr.msk.f32.vlgmr.msra.gmra.mrb[0].mxu0 %vm531_vm3, %v1248_v11 }
 0x48c   : > { %v1368_v6 = vpop.f32.mrb[0].mxu0 }
 0x48d   : > { %v1369_v29 = vadd.f32 %v1368_v6, %v1250_v18  ;;  %v1755_v1 = vpop.f32.mrb[1].mxu0 }
 0x48f   : > { %v1375_v22 = vand.u32 2147483647, %v1369_v29  ;;  %v1372_v23 = vmax.f32 %v1369_v29, 0.0  ;;  %vm1373_vm6 = vcmp.ne.f32.partialorder %v1369_v29, %v1369_v29 }
 0x491   : > { %v1376_v25 = vsub.f32 0.0, %v1375_v22 }
 0x493   : > { %v1377_v26 = vmul.f32 1.442695, %v1376_v25 }
 0x495   : > { %1995 = vpow2.f32 %v1377_v26 }
 0x49f   : > { %v1996_v44 = vpop.eup %1995 }
 0x4a0   : > { %v1379_v13 = vadd.f32 1.0, %v1996_v44  ;;  %v1382_v28 = vmul.f32 -0.5, %v1996_v44  ;;  %v1385_v35 = vand.u32 2147483647, %v1996_v44 }
 0x4a2   : > { %1997 = vlog2.f32 %v1379_v13  ;;  %v1383_v34 = vadd.f32 1.0, %v1382_v28  ;;  %vm1386_vm5 = vcmp.lt.f32.partialorder %v1385_v35, 0.0004427343 }
 0x4a4   : > { %v1384_v54 = vmul.f32 %v1996_v44, %v1383_v34 }
 0x4ac   : > { %v1998_v21 = vpop.eup %1997 }
 0x4ad   : > { %v1381_v59 = vmul.f32 0.6931472, %v1998_v21 }
 0x4af   : > { %v1387_v24 = vsel %vm1386_vm5, %v1384_v54, %v1381_v59 }
 0x4b0   : > { %v1388_v37 = vadd.f32 %v1387_v24, %v1372_v23 }
 0x4b2   : > { %v1389_v40 = vsel %vm1373_vm6, %v1369_v29, %v1388_v37 }
 0x4b3   : > { %1789 = vmatmul.mubr.f32.vlgmr.msra.gmra.mrb[18].mxu1 %v1389_v40 }
 0x586   : > { %v1472_v43 = vpop.f32.mrb[18].mxu1 }
 0x587   : > { %1999 = vrcp.f32 %v1472_v43  ;;  %v1790_v50 = vpop.f32.mrb[19].mxu1 }
 0x591   : > { %v2000_v42 = vpop.eup %1999 }
 0x592   : > { %v1477_v12 = vmul.f32 %v2000_v42, %v1389_v40 }
 0x594   : > { %1478 = vst [vmem:[%s338_s14] sm:$0x1] %v1477_v12 }
 0x595   : > { %2098 = shalt.err (!%p2095_p11)
}
 0x596   : > { %s2099_s27 = scalar_lea.hbm %s2843_s13, 16  ;;  %s2103_s2 = scalar_lea.hbm %s2893_s8, 32 }
 0x597   : > { %p2100_p13 = scmp.ne.s32.totalorder %s2843_s13, %s2099_s27  ;;  %p2104_p6 = scmp.lt.u32.totalorder %s2843_s13, %s2893_s8 }
 0x598   : > { %p2105_p5 = scmp.lt.u32.totalorder %s2103_s2, %s2099_s27  ;;  %p2107_p12 = scmp.lt.u32.totalorder %s2099_s27, %s2843_s13 }
 0x599   : > { %p2101_p1 = pnand %p2100_p13, %p2912_p10 }
 0x59a   : > { %p2106_p9 = por %p2105_p5, %p2104_p6 }
 0x59b   : > { %p2102_p0 = pneg %p2101_p1 }
 0x59c   : > { %p2108_p2 = por %p2107_p12, %p2106_p9 }
 0x59e   : > { %p2109_p3 = pnand %p2108_p2, %p2102_p0 }
 0x5a0   : > { %2112 = shalt.err (!%p2109_p3)
}
 0x5a1   : > { %1867 = dma.vmem_to_hbm [thread:$0]  (%p2912_p10), %s2845_s26, 16, %s2843_s13, %s1480_s19  }
 0x5a2 PF: > { %p1889_p4 = scmp.ge.s32.totalorder %s2155_s10, 2  ;;  %s1504_s25 = sand.u32 1, %s2143_s29  }
 0x5a3   : > { %p2913_p7 = scmp.ne.s32.totalorder %s2900_s17, 0  ;;  %s1505_s14 = scalar_lea.sflag [#allocation5], %s1504_s25 }
 0x5a5   : > { %p1880_p8 = pnand %p1889_p4, %p2913_p7 }
 0x5a7   : > { %2138 = dma.done.wait (!%p1880_p8), %s1505_s14, 16  }
 0x5a8   : > { %2140 = vsyncadd (!%p1880_p8), %s1505_s14, 4294967280  ;;  %s2914_s15 = sld [smem:[#allocation13_spill]]  ;;  %p21_p11 = scmp.ge.s32.totalorder %s2240_s12, 4  }
 0x5a9   : > { %s2915_s29 = smov %s2147_s30  ;;  %s2916_s30 = smov %s2151_s9 }
 0x5aa   : > { %s2918_s10 = smov %s2240_s12  ;;  %23 = sbr.rel (!%p21_p11) target bundleno = 8 (0x8), region = 100 }
 0x5ae   : > { %s2917_s9 = smov %s2914_s15 }
 0x5b1   :  { %1509 = vsyncpa [#allocation4], 1 }
 0x5b2   :  { %1511 = vsyncpa [#allocation4 + $0x1], 1 }
 0x5b3   :  { %1512 = vsyncpa [#allocation7], 1 }
 0x5b4   :  { %1513 = vsyncpa [#allocation5], 1 }
 0x5b5   :  { %1515 = vsyncpa [#allocation5 + $0x1], 1 }

</bundles_post_ra>
